<compile_context>
chip_gen: v6e
topology: v6e:2x2x1
jax: 0.10.0
libtpu: 0.0.40
codegen_flags: <defaults>
</compile_context>

<pallas_src>
import numpy as np
import jax
import jax.numpy as jnp
from jax import lax
from jax.experimental import pallas as pl
from jax.experimental.pallas import tpu as pltpu

FEAT_DIM = 32    # feat_vec_dim
HIDDEN_DIM = 32  # hidden_dim

_VMEM_SPEC = pl.BlockSpec(memory_space=pltpu.MemorySpace.VMEM)


def _round_up(n, m):
    return ((n + m - 1) // m) * m


def _dot(a, b):
    return jnp.dot(a, b, preferred_element_type=jnp.float32)


# --------------------------- fused Pallas kernel -----------------------------

def _fused_tree_kernel(fa_r_ref, fa_c_ref, son_r_ref, son_c_ref, sfl_r_ref, sfl_c_ref,
                       feat_ref,
                       wbu_ref, bz_ref, ur_ref, br_ref, uh_ref,
                       wtd_ref, btd_ref, uhd_ref,
                       ffnw_ref, ffnb_ref,
                       out_ref, h_ref, hd_ref):
    F = feat_ref.shape[1]
    H = uh_ref.shape[0]
    n_pad = feat_ref.shape[0]
    max_layer, max_fa = fa_r_ref.shape
    max_son = son_r_ref.shape[1]

    feat = feat_ref[...]                       # f32 (exact path)
    feat_b = feat.astype(jnp.bfloat16)         # bf16 copy for MXU-rate gathers

    fa_r, fa_c = fa_r_ref[...], fa_c_ref[...]
    son_r, son_c = son_r_ref[...], son_c_ref[...]
    sfl_r, sfl_c = sfl_r_ref[...], sfl_c_ref[...]

    wbu = wbu_ref[...]                         # (F+H, 3H) = [[Wz|Wr|Wh],[Uz|0|0]]
    bz = bz_ref[...]                           # (1, H)
    ur, br = ur_ref[...], br_ref[...]          # (H, H), (1, H)
    uh = uh_ref[...]                           # (H, H)
    wtd = wtd_ref[...]                         # (F+H, 3H) = [[Wzd|Wrd|Whd],[Uzd|Urd|0]]
    btd = btd_ref[...]                         # (1, 2H)   = [bzd | brd]
    uhd = uhd_ref[...]                         # (H, H)
    ffnw, ffnb = ffnw_ref[...], ffnb_ref[...]  # (2H, F), (1, F)

    def onehot(idx, shape, axis, dtype=jnp.float32):
        # {0,1} selection matrix; pad entries are -1 and never match -> zero row/col.
        io = lax.broadcasted_iota(jnp.int32, shape, axis)
        return jnp.where(io == idx, 1.0, 0.0).astype(dtype)

    def row_mask(idx_row):
        # (n_pad, 1) mask: 1 where node index appears in idx_row (1, K).
        io = lax.broadcasted_iota(jnp.int32, (n_pad, idx_row.shape[1]), 0)
        hit = jnp.where(io == idx_row, 1.0, 0.0)
        return jnp.sum(hit, axis=1, keepdims=True)

    # ---- leaf bottom-up GRU over ALL nodes, masked to layer-0 sons ----------
    # h_leaf = (1 - sigmoid(Wz x)) * tanh(Wh x)  (Wr(x) computed but unused in torch)
    wleaf = _dot(feat, wbu[:F, :])                       # (n_pad, 3H)
    z0 = jax.nn.sigmoid(wleaf[:, :H])
    h_leaf = (1.0 - z0) * jnp.tanh(wleaf[:, 2 * H:])
    h_ref[...] = row_mask(son_r[0:1, :]) * h_leaf        # zero for non-leaf rows

    # ---- bottom-up non-leaf layers (one-hots built lazily per layer) --------
    for l in range(max_layer):
        g_fa_b = onehot(fa_c[:, l:l + 1], (max_fa, n_pad), 1, jnp.bfloat16)
        g_sn = onehot(son_c[:, l:l + 1], (max_son, n_pad), 1)
        a_fs = onehot(sfl_r[l:l + 1, :], (max_fa, max_son), 0)   # A^T (father <- sons)
        a_sf = onehot(sfl_c[:, l:l + 1], (max_son, max_fa), 1)   # per-son father gather
        s_fa = onehot(fa_r[l:l + 1, :], (n_pad, max_fa), 0)      # scatter fathers

        head = _dot(g_fa_b, feat_b)                      # (max_fa, F)  bf16 MXU
        hson = _dot(g_sn, h_ref[...])                    # (max_son, H) f32
        hsum = _dot(a_fs, hson)                          # (max_fa, H)  A^T @ h_son
        wcat = _dot(jnp.concatenate([head, hsum], axis=1), wbu)   # (max_fa, 3H), K=64
        z = jax.nn.sigmoid(wcat[:, :H] + bz)             # Wz(head)+Uz(hsum)+bz
        sg = jax.nn.sigmoid(_dot(a_sf, wcat[:, H:2 * H]) + _dot(hson, ur) + br)
        fa_g = _dot(_dot(a_fs, sg * hson), uh)
        h_fa = z * hsum + (1.0 - z) * jnp.tanh(wcat[:, 2 * H:] + fa_g)
        h_ref[...] = h_ref[...] + _dot(s_fa, h_fa)       # each father written once

    # ---- top-down init: hd[fathers of deepest layer] = h[those] -------------
    hd_ref[...] = row_mask(fa_r[max_layer - 1:max_layer, :]) * h_ref[...]

    # ---- top-down 'tree-gru' layers ------------------------------------------
    for l in range(max_layer - 1, -1, -1):
        g_sn_b = onehot(son_c[:, l:l + 1], (max_son, n_pad), 1, jnp.bfloat16)
        g_fa = onehot(fa_c[:, l:l + 1], (max_fa, n_pad), 1)
        a_sf = onehot(sfl_c[:, l:l + 1], (max_son, max_fa), 1)
        s_sn = onehot(son_r[l:l + 1, :], (n_pad, max_son), 0)

        x = _dot(g_sn_b, feat_b)                         # (max_son, F)
        g = _dot(a_sf, _dot(g_fa, hd_ref[...]))          # hd[father of each son]
        wcat = _dot(jnp.concatenate([x, g], axis=1), wtd)         # (max_son, 3H), K=64
        zr = jax.nn.sigmoid(wcat[:, :2 * H] + btd)
        z, r = zr[:, :H], zr[:, H:]
        hd_son = z * g + (1.0 - z) * jnp.tanh(wcat[:, 2 * H:] + _dot(r * g, uhd))
        hd_ref[...] = hd_ref[...] + _dot(s_sn, hd_son)

    # ---- fused FFN: concat([h, hd]) @ [FFN1 ; FFN2] + (b1 + b2) --------------
    out_ref[...] = _dot(jnp.concatenate([h_ref[...], hd_ref[...]], axis=1), ffnw) + ffnb


# --------------------------- parameters --------------------------------------

def init_params(key, feat_dim=FEAT_DIM, hidden_dim=HIDDEN_DIM):
    # Weights stored pre-transposed: y = x @ W, W has shape (in, out).
    names = [
        ('Wz', (feat_dim, hidden_dim), False),
        ('Wr', (feat_dim, hidden_dim), False),
        ('Wh', (feat_dim, hidden_dim), False),
        ('Uh', (hidden_dim, hidden_dim), False),
        ('Uz', (hidden_dim, hidden_dim), True),
        ('Ur', (hidden_dim, hidden_dim), True),
        ('Whd', (feat_dim, hidden_dim), False),
        ('Wzd', (feat_dim, hidden_dim), False),
        ('Wrd', (feat_dim, hidden_dim), False),
        ('Uhd', (hidden_dim, hidden_dim), False),
        ('Uzd', (hidden_dim, hidden_dim), True),
        ('Urd', (hidden_dim, hidden_dim), True),
        ('FFN1', (hidden_dim, feat_dim), True),
        ('FFN2', (hidden_dim, feat_dim), True),
    ]
    params = {'feat_dim': feat_dim, 'hidden_dim': hidden_dim}
    keys = jax.random.split(key, 2 * len(names))
    ortho = jax.nn.initializers.orthogonal()
    for idx, (name, shape, has_bias) in enumerate(names):
        params[name + '_w'] = ortho(keys[2 * idx], shape, jnp.float32)
        if has_bias:
            params[name + '_b'] = 0.01 * jax.random.normal(
                keys[2 * idx + 1], (1, shape[1]), jnp.float32)
    return params


def pack_params(p):
    """Stack gate weights with their U matrices (host-side, once) for K=64 matmuls."""
    F, H = p['feat_dim'], p['hidden_dim']
    zH = jnp.zeros((H, H), jnp.float32)
    wbu = jnp.concatenate([
        jnp.concatenate([p['Wz_w'], p['Wr_w'], p['Wh_w']], axis=1),      # (F, 3H)
        jnp.concatenate([p['Uz_w'], zH, zH], axis=1),                    # (H, 3H)
    ], axis=0)                                                           # (F+H, 3H)
    wtd = jnp.concatenate([
        jnp.concatenate([p['Wzd_w'], p['Wrd_w'], p['Whd_w']], axis=1),   # (F, 3H)
        jnp.concatenate([p['Uzd_w'], p['Urd_w'], zH], axis=1),           # (H, 3H)
    ], axis=0)                                                           # (F+H, 3H)
    return {
        'wbu': wbu, 'bz': p['Uz_b'],
        'ur': p['Ur_w'], 'br': p['Ur_b'], 'uh': p['Uh_w'],
        'wtd': wtd, 'btd': jnp.concatenate([p['Uzd_b'], p['Urd_b']], axis=1),  # (1, 2H)
        'uhd': p['Uhd_w'],
        'ffn_w': jnp.concatenate([p['FFN1_w'], p['FFN2_w']], axis=0),    # (2H, F)
        'ffn_b': p['FFN1_b'] + p['FFN2_b'],                              # (1, F)
    }


# --------------------------- host-side tree glue -----------------------------

def _build_layer_tables(batch_nonleaf_node_layer_list, batch_size, sum_list):
    """Compact per-layer index tables (O(edges) host work, no dense adjacency).

    Pad value -1 never matches an iota -> zero row/col in the kernel's one-hots.
    Both row and column orientations are shipped so the kernel never transposes
    in-VMEM (the tables are tiny int32 arrays).
      fa_*  : father node indices per layer
      son_* : son node indices per layer
      sfl_* : each son's father's LOCAL index within that layer's father list
    """
    fa_layers, son_layers, sfl_layers = [], [], []
    for b in range(batch_size):
        for lid, layer in enumerate(batch_nonleaf_node_layer_list[b]):
            while len(fa_layers) < lid + 1:
                fa_layers.append([]); son_layers.append([]); sfl_layers.append([])
            for fa, sons in layer.items():
                local_fa = len(fa_layers[lid])
                fa_layers[lid].append(sum_list[b] + int(fa))
                for s in np.asarray(sons).ravel().tolist():
                    son_layers[lid].append(sum_list[b] + int(s))
                    sfl_layers[lid].append(local_fa)
    max_layer = len(fa_layers)
    max_fa = _round_up(max(len(x) for x in fa_layers), 8)
    max_son = _round_up(max(len(x) for x in son_layers), 8)

    fa_idx = np.full((max_layer, max_fa), -1, np.int32)
    son_idx = np.full((max_layer, max_son), -1, np.int32)
    sfl = np.full((max_layer, max_son), -1, np.int32)
    for l in range(max_layer):
        fa_idx[l, :len(fa_layers[l])] = fa_layers[l]
        son_idx[l, :len(son_layers[l])] = son_layers[l]
        sfl[l, :len(sfl_layers[l])] = sfl_layers[l]

    return {
        'fa_r': jnp.asarray(fa_idx), 'fa_c': jnp.asarray(fa_idx.T.copy()),
        'son_r': jnp.asarray(son_idx), 'son_c': jnp.asarray(son_idx.T.copy()),
        'sfl_r': jnp.asarray(sfl), 'sfl_c': jnp.asarray(sfl.T.copy()),
    }


# Reference-only helpers (dense adjacency used ONLY by the pure-JAX check).
def _cross_batch_layers(batch_nonleaf_node_layer_list, batch_size, sum_list):
    fa_set_list, son_set_list = [], []
    for b in range(batch_size):
        for layer_id, layer in enumerate(batch_nonleaf_node_layer_list[b]):
            if len(fa_set_list) < layer_id + 1:
                fa_set_list.append([]); son_set_list.append([])
            for fa, son in layer.items():
                fa_set_list[layer_id].append(sum_list[b] + fa)
                son_set_list[layer_id].append(sum_list[b] + np.asarray(son))
    max_layer_num = len(fa_set_list)
    fa_set_list = [np.asarray(f, dtype=np.int32) for f in fa_set_list]
    son_set_list = [np.hstack(s).astype(np.int32) for s in son_set_list]
    return fa_set_list, son_set_list, max_layer_num


def _cross_batch_adj(batch_size, sum_list, batch_adj):
    n = sum_list[batch_size]
    m = np.zeros((n, n), dtype=np.float32)
    for b in range(batch_size):
        m[sum_list[b]:sum_list[b + 1], sum_list[b]:sum_list[b + 1]] = batch_adj[b]
    return m


# --------------------------- forward (single fused Pallas call) --------------

def tree_message_passing2d_forward(params, roi, feat_vec, batch_size,
                                   batch_nonleaf_node_layer_list,
                                   batch_tree_bboxnum_list,
                                   batch_tree_bboxnum_sum_list,
                                   batch_leaf_bboxnum_list,
                                   batch_A, batch_A_T, batch_link):
    # roi / bboxnum / leaf / link / adjacency args kept for signature parity
    # (forward_v1 derives everything needed from the per-layer parent maps).
    del roi, batch_tree_bboxnum_list, batch_leaf_bboxnum_list, batch_link
    del batch_A, batch_A_T
    sum_list = batch_tree_bboxnum_sum_list
    n_nodes = sum_list[batch_size]
    H, F = params['hidden_dim'], params['feat_dim']

    tables = _build_layer_tables(batch_nonleaf_node_layer_list, batch_size, sum_list)
    packed = pack_params(params)

    n_pad = _round_up(max(n_nodes, 8), 8)
    feat = jnp.asarray(feat_vec, jnp.float32)
    feat_pad = jnp.zeros((n_pad, F), jnp.float32).at[:n_nodes, :].set(feat)

    max_layer, max_fa = tables['fa_r'].shape
    max_son = tables['son_r'].shape[1]

    # Rough VMEM footprint: resident arrays + ONE layer's lazily-built one-hot
    # selection matrices + intermediates (2x slack, 4 MiB headroom).  Capped
    # under v7x's 64 MiB physical VMEM per TensorCore.
    resident = 4 * (2 * n_pad * F + 2 * n_pad * H) + 2 * n_pad * F       # feat/out/h/hd + bf16 feat
    per_layer = (n_pad * (max_fa + max_son) * 10                         # gather/scatter one-hots
                 + max_fa * max_son * 8                                  # a_sf / a_fs
                 + (max_fa + max_son) * 4 * H * 16)                      # wcat & friends
    vmem_bytes = int(min(max(2 * (resident + per_layer) + (4 << 20), 16 << 20), 60 << 20))

    args = (tables['fa_r'], tables['fa_c'], tables['son_r'], tables['son_c'],
            tables['sfl_r'], tables['sfl_c'], feat_pad,
            packed['wbu'], packed['bz'], packed['ur'], packed['br'], packed['uh'],
            packed['wtd'], packed['btd'], packed['uhd'],
            packed['ffn_w'], packed['ffn_b'])

    out_pad = pl.pallas_call(
        _fused_tree_kernel,
        out_shape=jax.ShapeDtypeStruct((n_pad, F), jnp.float32),
        in_specs=[_VMEM_SPEC] * len(args),
        out_specs=_VMEM_SPEC,
        scratch_shapes=[pltpu.VMEM((n_pad, H), jnp.float32),   # h  (resident)
                        pltpu.VMEM((n_pad, H), jnp.float32)],  # hd (resident)
        compiler_params=pltpu.CompilerParams(vmem_limit_bytes=vmem_bytes),
    )(*args)
    return out_pad[:n_nodes]


# --------------------------- pure-JAX reference ------------------------------

def _ref_linear(x, w, b=None):
    y = jnp.dot(x, w, precision=jax.lax.Precision.HIGHEST)
    return y if b is None else y + b


def reference_forward(params, feat_vec, batch_size, batch_nonleaf_node_layer_list,
                      batch_tree_bboxnum_sum_list, batch_A, batch_A_T):
    sum_list = batch_tree_bboxnum_sum_list
    n_nodes = sum_list[batch_size]
    H = params['hidden_dim']
    fa_sets, son_sets, max_layer = _cross_batch_layers(
        batch_nonleaf_node_layer_list, batch_size, sum_list)
    cross_A_T = _cross_batch_adj(batch_size, sum_list, batch_A_T)
    cross_A = _cross_batch_adj(batch_size, sum_list, batch_A)
    feat_vec = jnp.asarray(feat_vec, jnp.float32)

    h = jnp.zeros((n_nodes, H), jnp.float32)
    x0 = feat_vec[son_sets[0]]
    z0 = jax.nn.sigmoid(_ref_linear(x0, params['Wz_w']))
    h = h.at[son_sets[0]].set((1 - z0) * jnp.tanh(_ref_linear(x0, params['Wh_w'])))

    for layer_id in range(max_layer):
        fa, son = fa_sets[layer_id], son_sets[layer_id]
        head, hson = feat_vec[fa], h[son]
        a_t = jnp.asarray(cross_A_T[np.ix_(fa, son)])
        h_son_sum = jnp.dot(a_t, hson, precision=jax.lax.Precision.HIGHEST)
        z = jax.nn.sigmoid(_ref_linear(head, params['Wz_w']) +
                           _ref_linear(h_son_sum, params['Uz_w'], params['Uz_b']))
        part1 = _ref_linear(head, params['Wr_w'])[:, None, :]
        part2 = _ref_linear(hson, params['Ur_w'], params['Ur_b'])[None, :, :]
        r = a_t[:, :, None] * jax.nn.sigmoid(part1 + part2)
        fa_g = _ref_linear((r * hson[None, :, :]).sum(axis=1), params['Uh_w'])
        h_fa = z * h_son_sum + (1 - z) * jnp.tanh(_ref_linear(head, params['Wh_w']) + fa_g)
        h = h.at[fa].set(h_fa)

    hd = jnp.zeros((n_nodes, H), jnp.float32)
    top_fa = fa_sets[max_layer - 1]
    hd = hd.at[top_fa].set(h[top_fa])
    for layer_id in range(max_layer - 1, -1, -1):
        fa, son = fa_sets[layer_id], son_sets[layer_id]
        x = feat_vec[son]
        a_np = cross_A[np.ix_(son, fa)]
        _, fa_pos = np.where(a_np > 0)          # mirrors torch.where ordering
        g = hd[fa][fa_pos]
        z = jax.nn.sigmoid(_ref_linear(x, params['Wzd_w']) +
                           _ref_linear(g, params['Uzd_w'], params['Uzd_b']))
        r = jax.nn.sigmoid(_ref_linear(x, params['Wrd_w']) +
                           _ref_linear(g, params['Urd_w'], params['Urd_b']))
        h_son = z * g + (1 - z) * jnp.tanh(_ref_linear(x, params['Whd_w']) +
                                           _ref_linear(r * g, params['Uhd_w']))
        hd = hd.at[son].set(h_son)

    return (_ref_linear(h, params['FFN1_w'], params['FFN1_b'])
            + _ref_linear(hd, params['FFN2_w'], params['FFN2_b']))


# --------------------------- demo ---------------------------------------------

if __name__ == "__main__":
    key = jax.random.PRNGKey(0)
    k_param, k_feat, k_roi = jax.random.split(key, 3)
    params = init_params(k_param)

    # Deterministic small batch of 2 trees (13 nodes total).
    batch_size = 2
    # tree 0: leaves 0..3, 4=parent(0,1), 5=parent(2,3), 6=root(4,5)
    tree0_layers = [{4: [0, 1], 5: [2, 3]}, {6: [4, 5]}]
    tree0_parent = {0: 4, 1: 4, 2: 5, 3: 5, 4: 6, 5: 6}
    n0 = 7
    # tree 1: leaves 0..2, 3=parent(2), 4=parent(1,0), 5=root(3,4)
    tree1_layers = [{3: [2], 4: [1, 0]}, {5: [3, 4]}]
    tree1_parent = {2: 3, 1: 4, 0: 4, 3: 5, 4: 5}
    n1 = 6

    def make_adj(n, parent):
        A = np.zeros((n, n), dtype=np.float32)
        for c, p in parent.items():
            A[c, p] = 1.0          # A[son, father] = 1
        return A

    A0, A1 = make_adj(n0, tree0_parent), make_adj(n1, tree1_parent)
    batch_A = [A0, A1]
    batch_A_T = [A0.T.copy(), A1.T.copy()]
    batch_nonleaf_node_layer_list = [tree0_layers, tree1_layers]
    batch_tree_bboxnum_list = [n0, n1]
    batch_tree_bboxnum_sum_list = [0, n0, n0 + n1]
    batch_leaf_bboxnum_list = [4, 3]
    batch_link = None  # unused by forward_v1

    n_nodes = batch_tree_bboxnum_sum_list[batch_size]
    feat_vec = jax.random.normal(k_feat, (n_nodes, FEAT_DIM), jnp.float32)
    roi = jax.random.normal(k_roi, (n_nodes, 4), jnp.float32)  # unused by forward_v1

    out = tree_message_passing2d_forward(
        params, roi, feat_vec, batch_size,
        batch_nonleaf_node_layer_list, batch_tree_bboxnum_list,
        batch_tree_bboxnum_sum_list, batch_leaf_bboxnum_list,
        batch_A, batch_A_T, batch_link)
    out = jax.block_until_ready(out)

    ref = reference_forward(params, feat_vec, batch_size,
                            batch_nonleaf_node_layer_list,
                            batch_tree_bboxnum_sum_list, batch_A, batch_A_T)
    ref = jax.block_until_ready(ref)

    assert out.shape == (n_nodes, FEAT_DIM) and out.dtype == jnp.float32
    np.testing.assert_allclose(np.asarray(out), np.asarray(ref), rtol=1e-2, atol=1e-2)
    print("KERNEL_OK")
</pallas_src>

<mosaic_0001>
module attributes {stable_mosaic.version = 11 : i64} {
  func.func @_fused_tree_kernel(%arg0: memref<2x8xi32, #tpu.memory_space<vmem>>, %arg1: memref<8x2xi32, #tpu.memory_space<vmem>>, %arg2: memref<2x8xi32, #tpu.memory_space<vmem>>, %arg3: memref<8x2xi32, #tpu.memory_space<vmem>>, %arg4: memref<2x8xi32, #tpu.memory_space<vmem>>, %arg5: memref<8x2xi32, #tpu.memory_space<vmem>>, %arg6: memref<16x32xf32, #tpu.memory_space<vmem>>, %arg7: memref<64x96xf32, #tpu.memory_space<vmem>>, %arg8: memref<1x32xf32, #tpu.memory_space<vmem>>, %arg9: memref<32x32xf32, #tpu.memory_space<vmem>>, %arg10: memref<1x32xf32, #tpu.memory_space<vmem>>, %arg11: memref<32x32xf32, #tpu.memory_space<vmem>>, %arg12: memref<64x96xf32, #tpu.memory_space<vmem>>, %arg13: memref<1x64xf32, #tpu.memory_space<vmem>>, %arg14: memref<32x32xf32, #tpu.memory_space<vmem>>, %arg15: memref<64x32xf32, #tpu.memory_space<vmem>>, %arg16: memref<1x32xf32, #tpu.memory_space<vmem>>, %arg17: memref<16x32xf32, #tpu.memory_space<vmem>>, %arg18: memref<16x32xf32, #tpu.memory_space<vmem>>, %arg19: memref<16x32xf32, #tpu.memory_space<vmem>>) attributes {dimension_semantics = [], scalar_prefetch = 0 : i64, scratch_operands = 2 : i64, tpu.core_type = #tpu.core_type<tc>} {
    %c0 = arith.constant 0 : index
    %c0_0 = arith.constant 0 : index
    %0 = vector.load %arg6[%c0, %c0_0] : memref<16x32xf32, #tpu.memory_space<vmem>>, vector<16x32xf32>
    %1 = arith.truncf %0 : vector<16x32xf32> to vector<16x32xbf16>
    %c0_1 = arith.constant 0 : index
    %c0_2 = arith.constant 0 : index
    %2 = vector.load %arg0[%c0_1, %c0_2] : memref<2x8xi32, #tpu.memory_space<vmem>>, vector<2x8xi32>
    %c0_3 = arith.constant 0 : index
    %c0_4 = arith.constant 0 : index
    %3 = vector.load %arg1[%c0_3, %c0_4] : memref<8x2xi32, #tpu.memory_space<vmem>>, vector<8x2xi32>
    %c0_5 = arith.constant 0 : index
    %c0_6 = arith.constant 0 : index
    %4 = vector.load %arg2[%c0_5, %c0_6] : memref<2x8xi32, #tpu.memory_space<vmem>>, vector<2x8xi32>
    %c0_7 = arith.constant 0 : index
    %c0_8 = arith.constant 0 : index
    %5 = vector.load %arg3[%c0_7, %c0_8] : memref<8x2xi32, #tpu.memory_space<vmem>>, vector<8x2xi32>
    %c0_9 = arith.constant 0 : index
    %c0_10 = arith.constant 0 : index
    %6 = vector.load %arg4[%c0_9, %c0_10] : memref<2x8xi32, #tpu.memory_space<vmem>>, vector<2x8xi32>
    %c0_11 = arith.constant 0 : index
    %c0_12 = arith.constant 0 : index
    %7 = vector.load %arg5[%c0_11, %c0_12] : memref<8x2xi32, #tpu.memory_space<vmem>>, vector<8x2xi32>
    %c0_13 = arith.constant 0 : index
    %c0_14 = arith.constant 0 : index
    %8 = vector.load %arg7[%c0_13, %c0_14] : memref<64x96xf32, #tpu.memory_space<vmem>>, vector<64x96xf32>
    %c0_15 = arith.constant 0 : index
    %c0_16 = arith.constant 0 : index
    %9 = vector.load %arg8[%c0_15, %c0_16] : memref<1x32xf32, #tpu.memory_space<vmem>>, vector<1x32xf32>
    %c0_17 = arith.constant 0 : index
    %c0_18 = arith.constant 0 : index
    %10 = vector.load %arg9[%c0_17, %c0_18] : memref<32x32xf32, #tpu.memory_space<vmem>>, vector<32x32xf32>
    %c0_19 = arith.constant 0 : index
    %c0_20 = arith.constant 0 : index
    %11 = vector.load %arg10[%c0_19, %c0_20] : memref<1x32xf32, #tpu.memory_space<vmem>>, vector<1x32xf32>
    %c0_21 = arith.constant 0 : index
    %c0_22 = arith.constant 0 : index
    %12 = vector.load %arg11[%c0_21, %c0_22] : memref<32x32xf32, #tpu.memory_space<vmem>>, vector<32x32xf32>
    %c0_23 = arith.constant 0 : index
    %c0_24 = arith.constant 0 : index
    %13 = vector.load %arg12[%c0_23, %c0_24] : memref<64x96xf32, #tpu.memory_space<vmem>>, vector<64x96xf32>
    %c0_25 = arith.constant 0 : index
    %c0_26 = arith.constant 0 : index
    %14 = vector.load %arg13[%c0_25, %c0_26] : memref<1x64xf32, #tpu.memory_space<vmem>>, vector<1x64xf32>
    %c0_27 = arith.constant 0 : index
    %c0_28 = arith.constant 0 : index
    %15 = vector.load %arg14[%c0_27, %c0_28] : memref<32x32xf32, #tpu.memory_space<vmem>>, vector<32x32xf32>
    %c0_29 = arith.constant 0 : index
    %c0_30 = arith.constant 0 : index
    %16 = vector.load %arg15[%c0_29, %c0_30] : memref<64x32xf32, #tpu.memory_space<vmem>>, vector<64x32xf32>
    %c0_31 = arith.constant 0 : index
    %c0_32 = arith.constant 0 : index
    %17 = vector.load %arg16[%c0_31, %c0_32] : memref<1x32xf32, #tpu.memory_space<vmem>>, vector<1x32xf32>
    %18 = vector.extract_strided_slice %8 {offsets = [0, 0], sizes = [32, 96], strides = [1, 1]} : vector<64x96xf32> to vector<32x96xf32>
    %cst = arith.constant dense<0.000000e+00> : vector<16x96xf32>
    %19 = tpu.matmul %0, %18, %cst {dimension_numbers = #tpu.dot_dimension_numbers<[1], [0], [0], [1], [0, 0, 1, 1], [], []>} : vector<16x32xf32>, vector<32x96xf32>, vector<16x96xf32> -> vector<16x96xf32>
    %20 = vector.extract_strided_slice %19 {offsets = [0, 0], sizes = [16, 32], strides = [1, 1]} : vector<16x96xf32> to vector<16x32xf32>
    %21 = arith.negf %20 : vector<16x32xf32>
    %22 = math.exp %21 : vector<16x32xf32>
    %cst_33 = arith.constant 1.000000e+00 : f32
    %23 = vector.broadcast %cst_33 : f32 to vector<16x32xf32>
    %24 = arith.addf %23, %22 : vector<16x32xf32>
    %25 = arith.divf %23, %24 : vector<16x32xf32>
    %cst_34 = arith.constant 1.000000e+00 : f32
    %26 = vector.broadcast %cst_34 : f32 to vector<16x32xf32>
    %27 = arith.subf %26, %25 : vector<16x32xf32>
    %28 = vector.extract_strided_slice %19 {offsets = [0, 64], sizes = [16, 32], strides = [1, 1]} : vector<16x96xf32> to vector<16x32xf32>
    %29 = math.tanh %28 : vector<16x32xf32>
    %30 = arith.mulf %27, %29 : vector<16x32xf32>
    %31 = vector.extract_strided_slice %4 {offsets = [0, 0], sizes = [1, 8], strides = [1, 1]} : vector<2x8xi32> to vector<1x8xi32>
    %32 = tpu.iota {dimensions = array<i32: 0>} : vector<16x8xi32>
    %33 = vector.broadcast %31 : vector<1x8xi32> to vector<16x8xi32>
    %34 = arith.cmpi eq, %32, %33 : vector<16x8xi32>
    %cst_35 = arith.constant 1.000000e+00 : f32
    %cst_36 = arith.constant 0.000000e+00 : f32
    %35 = vector.broadcast %cst_35 : f32 to vector<16x8xf32>
    %36 = vector.broadcast %cst_36 : f32 to vector<16x8xf32>
    %37 = arith.select %34, %35, %36 : vector<16x8xi1>, vector<16x8xf32>
    %cst_37 = arith.constant dense<0.000000e+00> : vector<16xf32>
    %38 = vector.multi_reduction <add>, %37, %cst_37 [1] : vector<16x8xf32> to vector<16xf32>
    %39 = vector.shape_cast %38 : vector<16xf32> to vector<16x1xf32>
    %40 = vector.broadcast %39 : vector<16x1xf32> to vector<16x32xf32>
    %41 = arith.mulf %40, %30 : vector<16x32xf32>
    %c0_38 = arith.constant 0 : index
    %c0_39 = arith.constant 0 : index
    %42 = vector.load %arg18[%c0_38, %c0_39] : memref<16x32xf32, #tpu.memory_space<vmem>>, vector<16x32xf32>
    tpu.vector_store %arg18[%c0_38, %c0_39], %41 {strides = array<i32>} : memref<16x32xf32, #tpu.memory_space<vmem>>, vector<16x32xf32>,
    %43 = vector.extract_strided_slice %3 {offsets = [0, 0], sizes = [8, 1], strides = [1, 1]} : vector<8x2xi32> to vector<8x1xi32>
    %44 = tpu.iota {dimensions = array<i32: 1>} : vector<8x16xi32>
    %45 = vector.broadcast %43 : vector<8x1xi32> to vector<8x16xi32>
    %46 = arith.cmpi eq, %44, %45 : vector<8x16xi32>
    %cst_40 = arith.constant 1.000000e+00 : f32
    %cst_41 = arith.constant 0.000000e+00 : f32
    %47 = vector.broadcast %cst_40 : f32 to vector<8x16xf32>
    %48 = vector.broadcast %cst_41 : f32 to vector<8x16xf32>
    %49 = arith.select %46, %47, %48 : vector<8x16xi1>, vector<8x16xf32>
    %50 = arith.truncf %49 : vector<8x16xf32> to vector<8x16xbf16>
    %51 = vector.extract_strided_slice %5 {offsets = [0, 0], sizes = [8, 1], strides = [1, 1]} : vector<8x2xi32> to vector<8x1xi32>
    %52 = tpu.iota {dimensions = array<i32: 1>} : vector<8x16xi32>
    %53 = vector.broadcast %51 : vector<8x1xi32> to vector<8x16xi32>
    %54 = arith.cmpi eq, %52, %53 : vector<8x16xi32>
    %cst_42 = arith.constant 1.000000e+00 : f32
    %cst_43 = arith.constant 0.000000e+00 : f32
    %55 = vector.broadcast %cst_42 : f32 to vector<8x16xf32>
    %56 = vector.broadcast %cst_43 : f32 to vector<8x16xf32>
    %57 = arith.select %54, %55, %56 : vector<8x16xi1>, vector<8x16xf32>
    %58 = vector.extract_strided_slice %6 {offsets = [0, 0], sizes = [1, 8], strides = [1, 1]} : vector<2x8xi32> to vector<1x8xi32>
    %59 = tpu.iota {dimensions = array<i32: 0>} : vector<8x8xi32>
    %60 = vector.broadcast %58 : vector<1x8xi32> to vector<8x8xi32>
    %61 = arith.cmpi eq, %59, %60 : vector<8x8xi32>
    %cst_44 = arith.constant 1.000000e+00 : f32
    %cst_45 = arith.constant 0.000000e+00 : f32
    %62 = vector.broadcast %cst_44 : f32 to vector<8x8xf32>
    %63 = vector.broadcast %cst_45 : f32 to vector<8x8xf32>
    %64 = arith.select %61, %62, %63 : vector<8x8xi1>, vector<8x8xf32>
    %65 = vector.extract_strided_slice %7 {offsets = [0, 0], sizes = [8, 1], strides = [1, 1]} : vector<8x2xi32> to vector<8x1xi32>
    %66 = tpu.iota {dimensions = array<i32: 1>} : vector<8x8xi32>
    %67 = vector.broadcast %65 : vector<8x1xi32> to vector<8x8xi32>
    %68 = arith.cmpi eq, %66, %67 : vector<8x8xi32>
    %cst_46 = arith.constant 1.000000e+00 : f32
    %cst_47 = arith.constant 0.000000e+00 : f32
    %69 = vector.broadcast %cst_46 : f32 to vector<8x8xf32>
    %70 = vector.broadcast %cst_47 : f32 to vector<8x8xf32>
    %71 = arith.select %68, %69, %70 : vector<8x8xi1>, vector<8x8xf32>
    %72 = vector.extract_strided_slice %2 {offsets = [0, 0], sizes = [1, 8], strides = [1, 1]} : vector<2x8xi32> to vector<1x8xi32>
    %73 = tpu.iota {dimensions = array<i32: 0>} : vector<16x8xi32>
    %74 = vector.broadcast %72 : vector<1x8xi32> to vector<16x8xi32>
    %75 = arith.cmpi eq, %73, %74 : vector<16x8xi32>
    %cst_48 = arith.constant 1.000000e+00 : f32
    %cst_49 = arith.constant 0.000000e+00 : f32
    %76 = vector.broadcast %cst_48 : f32 to vector<16x8xf32>
    %77 = vector.broadcast %cst_49 : f32 to vector<16x8xf32>
    %78 = arith.select %75, %76, %77 : vector<16x8xi1>, vector<16x8xf32>
    %cst_50 = arith.constant dense<0.000000e+00> : vector<8x32xf32>
    %79 = tpu.matmul %50, %1, %cst_50 {dimension_numbers = #tpu.dot_dimension_numbers<[1], [0], [0], [1], [0, 0, 1, 1], [], []>} : vector<8x16xbf16>, vector<16x32xbf16>, vector<8x32xf32> -> vector<8x32xf32>
    %c0_51 = arith.constant 0 : index
    %c0_52 = arith.constant 0 : index
    %80 = vector.load %arg18[%c0_51, %c0_52] : memref<16x32xf32, #tpu.memory_space<vmem>>, vector<16x32xf32>
    %cst_53 = arith.constant dense<0.000000e+00> : vector<8x32xf32>
    %81 = tpu.matmul %57, %80, %cst_53 {dimension_numbers = #tpu.dot_dimension_numbers<[1], [0], [0], [1], [0, 0, 1, 1], [], []>} : vector<8x16xf32>, vector<16x32xf32>, vector<8x32xf32> -> vector<8x32xf32>
    %cst_54 = arith.constant dense<0.000000e+00> : vector<8x32xf32>
    %82 = tpu.matmul %64, %81, %cst_54 {dimension_numbers = #tpu.dot_dimension_numbers<[1], [0], [0], [1], [0, 0, 1, 1], [], []>} : vector<8x8xf32>, vector<8x32xf32>, vector<8x32xf32> -> vector<8x32xf32>
    %83 = tpu.concatenate %79, %82 in 1 : vector<8x32xf32>, vector<8x32xf32> -> vector<8x64xf32>
    %cst_55 = arith.constant dense<0.000000e+00> : vector<8x96xf32>
    %84 = tpu.matmul %83, %8, %cst_55 {dimension_numbers = #tpu.dot_dimension_numbers<[1], [0], [0], [1], [0, 0, 1, 1], [], []>} : vector<8x64xf32>, vector<64x96xf32>, vector<8x96xf32> -> vector<8x96xf32>
    %85 = vector.extract_strided_slice %84 {offsets = [0, 0], sizes = [8, 32], strides = [1, 1]} : vector<8x96xf32> to vector<8x32xf32>
    %86 = vector.broadcast %9 : vector<1x32xf32> to vector<8x32xf32>
    %87 = arith.addf %85, %86 : vector<8x32xf32>
    %88 = arith.negf %87 : vector<8x32xf32>
    %89 = math.exp %88 : vector<8x32xf32>
    %cst_56 = arith.constant 1.000000e+00 : f32
    %90 = vector.broadcast %cst_56 : f32 to vector<8x32xf32>
    %91 = arith.addf %90, %89 : vector<8x32xf32>
    %92 = arith.divf %90, %91 : vector<8x32xf32>
    %93 = vector.extract_strided_slice %84 {offsets = [0, 32], sizes = [8, 32], strides = [1, 1]} : vector<8x96xf32> to vector<8x32xf32>
    %cst_57 = arith.constant dense<0.000000e+00> : vector<8x32xf32>
    %94 = tpu.matmul %71, %93, %cst_57 {dimension_numbers = #tpu.dot_dimension_numbers<[1], [0], [0], [1], [0, 0, 1, 1], [], []>} : vector<8x8xf32>, vector<8x32xf32>, vector<8x32xf32> -> vector<8x32xf32>
    %cst_58 = arith.constant dense<0.000000e+00> : vector<8x32xf32>
    %95 = tpu.matmul %81, %10, %cst_58 {dimension_numbers = #tpu.dot_dimension_numbers<[1], [0], [0], [1], [0, 0, 1, 1], [], []>} : vector<8x32xf32>, vector<32x32xf32>, vector<8x32xf32> -> vector<8x32xf32>
    %96 = arith.addf %94, %95 : vector<8x32xf32>
    %97 = vector.broadcast %11 : vector<1x32xf32> to vector<8x32xf32>
    %98 = arith.addf %96, %97 : vector<8x32xf32>
    %99 = arith.negf %98 : vector<8x32xf32>
    %100 = math.exp %99 : vector<8x32xf32>
    %cst_59 = arith.constant 1.000000e+00 : f32
    %101 = vector.broadcast %cst_59 : f32 to vector<8x32xf32>
    %102 = arith.addf %101, %100 : vector<8x32xf32>
    %103 = arith.divf %101, %102 : vector<8x32xf32>
    %104 = arith.mulf %103, %81 : vector<8x32xf32>
    %cst_60 = arith.constant dense<0.000000e+00> : vector<8x32xf32>
    %105 = tpu.matmul %64, %104, %cst_60 {dimension_numbers = #tpu.dot_dimension_numbers<[1], [0], [0], [1], [0, 0, 1, 1], [], []>} : vector<8x8xf32>, vector<8x32xf32>, vector<8x32xf32> -> vector<8x32xf32>
    %cst_61 = arith.constant dense<0.000000e+00> : vector<8x32xf32>
    %106 = tpu.matmul %105, %12, %cst_61 {dimension_numbers = #tpu.dot_dimension_numbers<[1], [0], [0], [1], [0, 0, 1, 1], [], []>} : vector<8x32xf32>, vector<32x32xf32>, vector<8x32xf32> -> vector<8x32xf32>
    %107 = arith.mulf %92, %82 : vector<8x32xf32>
    %cst_62 = arith.constant 1.000000e+00 : f32
    %108 = vector.broadcast %cst_62 : f32 to vector<8x32xf32>
    %109 = arith.subf %108, %92 : vector<8x32xf32>
    %110 = vector.extract_strided_slice %84 {offsets = [0, 64], sizes = [8, 32], strides = [1, 1]} : vector<8x96xf32> to vector<8x32xf32>
    %111 = arith.addf %110, %106 : vector<8x32xf32>
    %112 = math.tanh %111 : vector<8x32xf32>
    %113 = arith.mulf %109, %112 : vector<8x32xf32>
    %114 = arith.addf %107, %113 : vector<8x32xf32>
    %c0_63 = arith.constant 0 : index
    %c0_64 = arith.constant 0 : index
    %115 = vector.load %arg18[%c0_63, %c0_64] : memref<16x32xf32, #tpu.memory_space<vmem>>, vector<16x32xf32>
    %cst_65 = arith.constant dense<0.000000e+00> : vector<16x32xf32>
    %116 = tpu.matmul %78, %114, %cst_65 {dimension_numbers = #tpu.dot_dimension_numbers<[1], [0], [0], [1], [0, 0, 1, 1], [], []>} : vector<16x8xf32>, vector<8x32xf32>, vector<16x32xf32> -> vector<16x32xf32>
    %117 = arith.addf %115, %116 : vector<16x32xf32>
    %c0_66 = arith.constant 0 : index
    %c0_67 = arith.constant 0 : index
    %118 = vector.load %arg18[%c0_66, %c0_67] : memref<16x32xf32, #tpu.memory_space<vmem>>, vector<16x32xf32>
    tpu.vector_store %arg18[%c0_66, %c0_67], %117 {strides = array<i32>} : memref<16x32xf32, #tpu.memory_space<vmem>>, vector<16x32xf32>,
    %119 = vector.extract_strided_slice %3 {offsets = [0, 1], sizes = [8, 1], strides = [1, 1]} : vector<8x2xi32> to vector<8x1xi32>
    %120 = tpu.iota {dimensions = array<i32: 1>} : vector<8x16xi32>
    %121 = vector.broadcast %119 : vector<8x1xi32> to vector<8x16xi32>
    %122 = arith.cmpi eq, %120, %121 : vector<8x16xi32>
    %cst_68 = arith.constant 1.000000e+00 : f32
    %cst_69 = arith.constant 0.000000e+00 : f32
    %123 = vector.broadcast %cst_68 : f32 to vector<8x16xf32>
    %124 = vector.broadcast %cst_69 : f32 to vector<8x16xf32>
    %125 = arith.select %122, %123, %124 : vector<8x16xi1>, vector<8x16xf32>
    %126 = arith.truncf %125 : vector<8x16xf32> to vector<8x16xbf16>
    %127 = vector.extract_strided_slice %5 {offsets = [0, 1], sizes = [8, 1], strides = [1, 1]} : vector<8x2xi32> to vector<8x1xi32>
    %128 = tpu.iota {dimensions = array<i32: 1>} : vector<8x16xi32>
    %129 = vector.broadcast %127 : vector<8x1xi32> to vector<8x16xi32>
    %130 = arith.cmpi eq, %128, %129 : vector<8x16xi32>
    %cst_70 = arith.constant 1.000000e+00 : f32
    %cst_71 = arith.constant 0.000000e+00 : f32
    %131 = vector.broadcast %cst_70 : f32 to vector<8x16xf32>
    %132 = vector.broadcast %cst_71 : f32 to vector<8x16xf32>
    %133 = arith.select %130, %131, %132 : vector<8x16xi1>, vector<8x16xf32>
    %134 = vector.extract_strided_slice %6 {offsets = [1, 0], sizes = [1, 8], strides = [1, 1]} : vector<2x8xi32> to vector<1x8xi32>
    %135 = tpu.iota {dimensions = array<i32: 0>} : vector<8x8xi32>
    %136 = vector.broadcast %134 : vector<1x8xi32> to vector<8x8xi32>
    %137 = arith.cmpi eq, %135, %136 : vector<8x8xi32>
    %cst_72 = arith.constant 1.000000e+00 : f32
    %cst_73 = arith.constant 0.000000e+00 : f32
    %138 = vector.broadcast %cst_72 : f32 to vector<8x8xf32>
    %139 = vector.broadcast %cst_73 : f32 to vector<8x8xf32>
    %140 = arith.select %137, %138, %139 : vector<8x8xi1>, vector<8x8xf32>
    %141 = vector.extract_strided_slice %7 {offsets = [0, 1], sizes = [8, 1], strides = [1, 1]} : vector<8x2xi32> to vector<8x1xi32>
    %142 = tpu.iota {dimensions = array<i32: 1>} : vector<8x8xi32>
    %143 = vector.broadcast %141 : vector<8x1xi32> to vector<8x8xi32>
    %144 = arith.cmpi eq, %142, %143 : vector<8x8xi32>
    %cst_74 = arith.constant 1.000000e+00 : f32
    %cst_75 = arith.constant 0.000000e+00 : f32
    %145 = vector.broadcast %cst_74 : f32 to vector<8x8xf32>
    %146 = vector.broadcast %cst_75 : f32 to vector<8x8xf32>
    %147 = arith.select %144, %145, %146 : vector<8x8xi1>, vector<8x8xf32>
    %148 = vector.extract_strided_slice %2 {offsets = [1, 0], sizes = [1, 8], strides = [1, 1]} : vector<2x8xi32> to vector<1x8xi32>
    %149 = tpu.iota {dimensions = array<i32: 0>} : vector<16x8xi32>
    %150 = vector.broadcast %148 : vector<1x8xi32> to vector<16x8xi32>
    %151 = arith.cmpi eq, %149, %150 : vector<16x8xi32>
    %cst_76 = arith.constant 1.000000e+00 : f32
    %cst_77 = arith.constant 0.000000e+00 : f32
    %152 = vector.broadcast %cst_76 : f32 to vector<16x8xf32>
    %153 = vector.broadcast %cst_77 : f32 to vector<16x8xf32>
    %154 = arith.select %151, %152, %153 : vector<16x8xi1>, vector<16x8xf32>
    %cst_78 = arith.constant dense<0.000000e+00> : vector<8x32xf32>
    %155 = tpu.matmul %126, %1, %cst_78 {dimension_numbers = #tpu.dot_dimension_numbers<[1], [0], [0], [1], [0, 0, 1, 1], [], []>} : vector<8x16xbf16>, vector<16x32xbf16>, vector<8x32xf32> -> vector<8x32xf32>
    %c0_79 = arith.constant 0 : index
    %c0_80 = arith.constant 0 : index
    %156 = vector.load %arg18[%c0_79, %c0_80] : memref<16x32xf32, #tpu.memory_space<vmem>>, vector<16x32xf32>
    %cst_81 = arith.constant dense<0.000000e+00> : vector<8x32xf32>
    %157 = tpu.matmul %133, %156, %cst_81 {dimension_numbers = #tpu.dot_dimension_numbers<[1], [0], [0], [1], [0, 0, 1, 1], [], []>} : vector<8x16xf32>, vector<16x32xf32>, vector<8x32xf32> -> vector<8x32xf32>
    %cst_82 = arith.constant dense<0.000000e+00> : vector<8x32xf32>
    %158 = tpu.matmul %140, %157, %cst_82 {dimension_numbers = #tpu.dot_dimension_numbers<[1], [0], [0], [1], [0, 0, 1, 1], [], []>} : vector<8x8xf32>, vector<8x32xf32>, vector<8x32xf32> -> vector<8x32xf32>
    %159 = tpu.concatenate %155, %158 in 1 : vector<8x32xf32>, vector<8x32xf32> -> vector<8x64xf32>
    %cst_83 = arith.constant dense<0.000000e+00> : vector<8x96xf32>
    %160 = tpu.matmul %159, %8, %cst_83 {dimension_numbers = #tpu.dot_dimension_numbers<[1], [0], [0], [1], [0, 0, 1, 1], [], []>} : vector<8x64xf32>, vector<64x96xf32>, vector<8x96xf32> -> vector<8x96xf32>
    %161 = vector.extract_strided_slice %160 {offsets = [0, 0], sizes = [8, 32], strides = [1, 1]} : vector<8x96xf32> to vector<8x32xf32>
    %162 = vector.broadcast %9 : vector<1x32xf32> to vector<8x32xf32>
    %163 = arith.addf %161, %162 : vector<8x32xf32>
    %164 = arith.negf %163 : vector<8x32xf32>
    %165 = math.exp %164 : vector<8x32xf32>
    %cst_84 = arith.constant 1.000000e+00 : f32
    %166 = vector.broadcast %cst_84 : f32 to vector<8x32xf32>
    %167 = arith.addf %166, %165 : vector<8x32xf32>
    %168 = arith.divf %166, %167 : vector<8x32xf32>
    %169 = vector.extract_strided_slice %160 {offsets = [0, 32], sizes = [8, 32], strides = [1, 1]} : vector<8x96xf32> to vector<8x32xf32>
    %cst_85 = arith.constant dense<0.000000e+00> : vector<8x32xf32>
    %170 = tpu.matmul %147, %169, %cst_85 {dimension_numbers = #tpu.dot_dimension_numbers<[1], [0], [0], [1], [0, 0, 1, 1], [], []>} : vector<8x8xf32>, vector<8x32xf32>, vector<8x32xf32> -> vector<8x32xf32>
    %cst_86 = arith.constant dense<0.000000e+00> : vector<8x32xf32>
    %171 = tpu.matmul %157, %10, %cst_86 {dimension_numbers = #tpu.dot_dimension_numbers<[1], [0], [0], [1], [0, 0, 1, 1], [], []>} : vector<8x32xf32>, vector<32x32xf32>, vector<8x32xf32> -> vector<8x32xf32>
    %172 = arith.addf %170, %171 : vector<8x32xf32>
    %173 = vector.broadcast %11 : vector<1x32xf32> to vector<8x32xf32>
    %174 = arith.addf %172, %173 : vector<8x32xf32>
    %175 = arith.negf %174 : vector<8x32xf32>
    %176 = math.exp %175 : vector<8x32xf32>
    %cst_87 = arith.constant 1.000000e+00 : f32
    %177 = vector.broadcast %cst_87 : f32 to vector<8x32xf32>
    %178 = arith.addf %177, %176 : vector<8x32xf32>
    %179 = arith.divf %177, %178 : vector<8x32xf32>
    %180 = arith.mulf %179, %157 : vector<8x32xf32>
    %cst_88 = arith.constant dense<0.000000e+00> : vector<8x32xf32>
    %181 = tpu.matmul %140, %180, %cst_88 {dimension_numbers = #tpu.dot_dimension_numbers<[1], [0], [0], [1], [0, 0, 1, 1], [], []>} : vector<8x8xf32>, vector<8x32xf32>, vector<8x32xf32> -> vector<8x32xf32>
    %cst_89 = arith.constant dense<0.000000e+00> : vector<8x32xf32>
    %182 = tpu.matmul %181, %12, %cst_89 {dimension_numbers = #tpu.dot_dimension_numbers<[1], [0], [0], [1], [0, 0, 1, 1], [], []>} : vector<8x32xf32>, vector<32x32xf32>, vector<8x32xf32> -> vector<8x32xf32>
    %183 = arith.mulf %168, %158 : vector<8x32xf32>
    %cst_90 = arith.constant 1.000000e+00 : f32
    %184 = vector.broadcast %cst_90 : f32 to vector<8x32xf32>
    %185 = arith.subf %184, %168 : vector<8x32xf32>
    %186 = vector.extract_strided_slice %160 {offsets = [0, 64], sizes = [8, 32], strides = [1, 1]} : vector<8x96xf32> to vector<8x32xf32>
    %187 = arith.addf %186, %182 : vector<8x32xf32>
    %188 = math.tanh %187 : vector<8x32xf32>
    %189 = arith.mulf %185, %188 : vector<8x32xf32>
    %190 = arith.addf %183, %189 : vector<8x32xf32>
    %c0_91 = arith.constant 0 : index
    %c0_92 = arith.constant 0 : index
    %191 = vector.load %arg18[%c0_91, %c0_92] : memref<16x32xf32, #tpu.memory_space<vmem>>, vector<16x32xf32>
    %cst_93 = arith.constant dense<0.000000e+00> : vector<16x32xf32>
    %192 = tpu.matmul %154, %190, %cst_93 {dimension_numbers = #tpu.dot_dimension_numbers<[1], [0], [0], [1], [0, 0, 1, 1], [], []>} : vector<16x8xf32>, vector<8x32xf32>, vector<16x32xf32> -> vector<16x32xf32>
    %193 = arith.addf %191, %192 : vector<16x32xf32>
    %c0_94 = arith.constant 0 : index
    %c0_95 = arith.constant 0 : index
    %194 = vector.load %arg18[%c0_94, %c0_95] : memref<16x32xf32, #tpu.memory_space<vmem>>, vector<16x32xf32>
    tpu.vector_store %arg18[%c0_94, %c0_95], %193 {strides = array<i32>} : memref<16x32xf32, #tpu.memory_space<vmem>>, vector<16x32xf32>,
    %195 = vector.extract_strided_slice %2 {offsets = [1, 0], sizes = [1, 8], strides = [1, 1]} : vector<2x8xi32> to vector<1x8xi32>
    %196 = tpu.iota {dimensions = array<i32: 0>} : vector<16x8xi32>
    %197 = vector.broadcast %195 : vector<1x8xi32> to vector<16x8xi32>
    %198 = arith.cmpi eq, %196, %197 : vector<16x8xi32>
    %cst_96 = arith.constant 1.000000e+00 : f32
    %cst_97 = arith.constant 0.000000e+00 : f32
    %199 = vector.broadcast %cst_96 : f32 to vector<16x8xf32>
    %200 = vector.broadcast %cst_97 : f32 to vector<16x8xf32>
    %201 = arith.select %198, %199, %200 : vector<16x8xi1>, vector<16x8xf32>
    %cst_98 = arith.constant dense<0.000000e+00> : vector<16xf32>
    %202 = vector.multi_reduction <add>, %201, %cst_98 [1] : vector<16x8xf32> to vector<16xf32>
    %203 = vector.shape_cast %202 : vector<16xf32> to vector<16x1xf32>
    %c0_99 = arith.constant 0 : index
    %c0_100 = arith.constant 0 : index
    %204 = vector.load %arg18[%c0_99, %c0_100] : memref<16x32xf32, #tpu.memory_space<vmem>>, vector<16x32xf32>
    %205 = vector.broadcast %203 : vector<16x1xf32> to vector<16x32xf32>
    %206 = arith.mulf %205, %204 : vector<16x32xf32>
    %c0_101 = arith.constant 0 : index
    %c0_102 = arith.constant 0 : index
    %207 = vector.load %arg19[%c0_101, %c0_102] : memref<16x32xf32, #tpu.memory_space<vmem>>, vector<16x32xf32>
    tpu.vector_store %arg19[%c0_101, %c0_102], %206 {strides = array<i32>} : memref<16x32xf32, #tpu.memory_space<vmem>>, vector<16x32xf32>,
    %208 = vector.extract_strided_slice %5 {offsets = [0, 1], sizes = [8, 1], strides = [1, 1]} : vector<8x2xi32> to vector<8x1xi32>
    %209 = tpu.iota {dimensions = array<i32: 1>} : vector<8x16xi32>
    %210 = vector.broadcast %208 : vector<8x1xi32> to vector<8x16xi32>
    %211 = arith.cmpi eq, %209, %210 : vector<8x16xi32>
    %cst_103 = arith.constant 1.000000e+00 : f32
    %cst_104 = arith.constant 0.000000e+00 : f32
    %212 = vector.broadcast %cst_103 : f32 to vector<8x16xf32>
    %213 = vector.broadcast %cst_104 : f32 to vector<8x16xf32>
    %214 = arith.select %211, %212, %213 : vector<8x16xi1>, vector<8x16xf32>
    %215 = arith.truncf %214 : vector<8x16xf32> to vector<8x16xbf16>
    %216 = vector.extract_strided_slice %3 {offsets = [0, 1], sizes = [8, 1], strides = [1, 1]} : vector<8x2xi32> to vector<8x1xi32>
    %217 = tpu.iota {dimensions = array<i32: 1>} : vector<8x16xi32>
    %218 = vector.broadcast %216 : vector<8x1xi32> to vector<8x16xi32>
    %219 = arith.cmpi eq, %217, %218 : vector<8x16xi32>
    %cst_105 = arith.constant 1.000000e+00 : f32
    %cst_106 = arith.constant 0.000000e+00 : f32
    %220 = vector.broadcast %cst_105 : f32 to vector<8x16xf32>
    %221 = vector.broadcast %cst_106 : f32 to vector<8x16xf32>
    %222 = arith.select %219, %220, %221 : vector<8x16xi1>, vector<8x16xf32>
    %223 = vector.extract_strided_slice %7 {offsets = [0, 1], sizes = [8, 1], strides = [1, 1]} : vector<8x2xi32> to vector<8x1xi32>
    %224 = tpu.iota {dimensions = array<i32: 1>} : vector<8x8xi32>
    %225 = vector.broadcast %223 : vector<8x1xi32> to vector<8x8xi32>
    %226 = arith.cmpi eq, %224, %225 : vector<8x8xi32>
    %cst_107 = arith.constant 1.000000e+00 : f32
    %cst_108 = arith.constant 0.000000e+00 : f32
    %227 = vector.broadcast %cst_107 : f32 to vector<8x8xf32>
    %228 = vector.broadcast %cst_108 : f32 to vector<8x8xf32>
    %229 = arith.select %226, %227, %228 : vector<8x8xi1>, vector<8x8xf32>
    %230 = vector.extract_strided_slice %4 {offsets = [1, 0], sizes = [1, 8], strides = [1, 1]} : vector<2x8xi32> to vector<1x8xi32>
    %231 = tpu.iota {dimensions = array<i32: 0>} : vector<16x8xi32>
    %232 = vector.broadcast %230 : vector<1x8xi32> to vector<16x8xi32>
    %233 = arith.cmpi eq, %231, %232 : vector<16x8xi32>
    %cst_109 = arith.constant 1.000000e+00 : f32
    %cst_110 = arith.constant 0.000000e+00 : f32
    %234 = vector.broadcast %cst_109 : f32 to vector<16x8xf32>
    %235 = vector.broadcast %cst_110 : f32 to vector<16x8xf32>
    %236 = arith.select %233, %234, %235 : vector<16x8xi1>, vector<16x8xf32>
    %cst_111 = arith.constant dense<0.000000e+00> : vector<8x32xf32>
    %237 = tpu.matmul %215, %1, %cst_111 {dimension_numbers = #tpu.dot_dimension_numbers<[1], [0], [0], [1], [0, 0, 1, 1], [], []>} : vector<8x16xbf16>, vector<16x32xbf16>, vector<8x32xf32> -> vector<8x32xf32>
    %c0_112 = arith.constant 0 : index
    %c0_113 = arith.constant 0 : index
    %238 = vector.load %arg19[%c0_112, %c0_113] : memref<16x32xf32, #tpu.memory_space<vmem>>, vector<16x32xf32>
    %cst_114 = arith.constant dense<0.000000e+00> : vector<8x32xf32>
    %239 = tpu.matmul %222, %238, %cst_114 {dimension_numbers = #tpu.dot_dimension_numbers<[1], [0], [0], [1], [0, 0, 1, 1], [], []>} : vector<8x16xf32>, vector<16x32xf32>, vector<8x32xf32> -> vector<8x32xf32>
    %cst_115 = arith.constant dense<0.000000e+00> : vector<8x32xf32>
    %240 = tpu.matmul %229, %239, %cst_115 {dimension_numbers = #tpu.dot_dimension_numbers<[1], [0], [0], [1], [0, 0, 1, 1], [], []>} : vector<8x8xf32>, vector<8x32xf32>, vector<8x32xf32> -> vector<8x32xf32>
    %241 = tpu.concatenate %237, %240 in 1 : vector<8x32xf32>, vector<8x32xf32> -> vector<8x64xf32>
    %cst_116 = arith.constant dense<0.000000e+00> : vector<8x96xf32>
    %242 = tpu.matmul %241, %13, %cst_116 {dimension_numbers = #tpu.dot_dimension_numbers<[1], [0], [0], [1], [0, 0, 1, 1], [], []>} : vector<8x64xf32>, vector<64x96xf32>, vector<8x96xf32> -> vector<8x96xf32>
    %243 = vector.extract_strided_slice %242 {offsets = [0, 0], sizes = [8, 64], strides = [1, 1]} : vector<8x96xf32> to vector<8x64xf32>
    %244 = vector.broadcast %14 : vector<1x64xf32> to vector<8x64xf32>
    %245 = arith.addf %243, %244 : vector<8x64xf32>
    %246 = arith.negf %245 : vector<8x64xf32>
    %247 = math.exp %246 : vector<8x64xf32>
    %cst_117 = arith.constant 1.000000e+00 : f32
    %248 = vector.broadcast %cst_117 : f32 to vector<8x64xf32>
    %249 = arith.addf %248, %247 : vector<8x64xf32>
    %250 = arith.divf %248, %249 : vector<8x64xf32>
    %251 = vector.extract_strided_slice %250 {offsets = [0, 0], sizes = [8, 32], strides = [1, 1]} : vector<8x64xf32> to vector<8x32xf32>
    %252 = vector.extract_strided_slice %250 {offsets = [0, 32], sizes = [8, 32], strides = [1, 1]} : vector<8x64xf32> to vector<8x32xf32>
    %253 = arith.mulf %251, %240 : vector<8x32xf32>
    %cst_118 = arith.constant 1.000000e+00 : f32
    %254 = vector.broadcast %cst_118 : f32 to vector<8x32xf32>
    %255 = arith.subf %254, %251 : vector<8x32xf32>
    %256 = vector.extract_strided_slice %242 {offsets = [0, 64], sizes = [8, 32], strides = [1, 1]} : vector<8x96xf32> to vector<8x32xf32>
    %257 = arith.mulf %252, %240 : vector<8x32xf32>
    %cst_119 = arith.constant dense<0.000000e+00> : vector<8x32xf32>
    %258 = tpu.matmul %257, %15, %cst_119 {dimension_numbers = #tpu.dot_dimension_numbers<[1], [0], [0], [1], [0, 0, 1, 1], [], []>} : vector<8x32xf32>, vector<32x32xf32>, vector<8x32xf32> -> vector<8x32xf32>
    %259 = arith.addf %256, %258 : vector<8x32xf32>
    %260 = math.tanh %259 : vector<8x32xf32>
    %261 = arith.mulf %255, %260 : vector<8x32xf32>
    %262 = arith.addf %253, %261 : vector<8x32xf32>
    %c0_120 = arith.constant 0 : index
    %c0_121 = arith.constant 0 : index
    %263 = vector.load %arg19[%c0_120, %c0_121] : memref<16x32xf32, #tpu.memory_space<vmem>>, vector<16x32xf32>
    %cst_122 = arith.constant dense<0.000000e+00> : vector<16x32xf32>
    %264 = tpu.matmul %236, %262, %cst_122 {dimension_numbers = #tpu.dot_dimension_numbers<[1], [0], [0], [1], [0, 0, 1, 1], [], []>} : vector<16x8xf32>, vector<8x32xf32>, vector<16x32xf32> -> vector<16x32xf32>
    %265 = arith.addf %263, %264 : vector<16x32xf32>
    %c0_123 = arith.constant 0 : index
    %c0_124 = arith.constant 0 : index
    %266 = vector.load %arg19[%c0_123, %c0_124] : memref<16x32xf32, #tpu.memory_space<vmem>>, vector<16x32xf32>
    tpu.vector_store %arg19[%c0_123, %c0_124], %265 {strides = array<i32>} : memref<16x32xf32, #tpu.memory_space<vmem>>, vector<16x32xf32>,
    %267 = vector.extract_strided_slice %5 {offsets = [0, 0], sizes = [8, 1], strides = [1, 1]} : vector<8x2xi32> to vector<8x1xi32>
    %268 = tpu.iota {dimensions = array<i32: 1>} : vector<8x16xi32>
    %269 = vector.broadcast %267 : vector<8x1xi32> to vector<8x16xi32>
    %270 = arith.cmpi eq, %268, %269 : vector<8x16xi32>
    %cst_125 = arith.constant 1.000000e+00 : f32
    %cst_126 = arith.constant 0.000000e+00 : f32
    %271 = vector.broadcast %cst_125 : f32 to vector<8x16xf32>
    %272 = vector.broadcast %cst_126 : f32 to vector<8x16xf32>
    %273 = arith.select %270, %271, %272 : vector<8x16xi1>, vector<8x16xf32>
    %274 = arith.truncf %273 : vector<8x16xf32> to vector<8x16xbf16>
    %275 = vector.extract_strided_slice %3 {offsets = [0, 0], sizes = [8, 1], strides = [1, 1]} : vector<8x2xi32> to vector<8x1xi32>
    %276 = tpu.iota {dimensions = array<i32: 1>} : vector<8x16xi32>
    %277 = vector.broadcast %275 : vector<8x1xi32> to vector<8x16xi32>
    %278 = arith.cmpi eq, %276, %277 : vector<8x16xi32>
    %cst_127 = arith.constant 1.000000e+00 : f32
    %cst_128 = arith.constant 0.000000e+00 : f32
    %279 = vector.broadcast %cst_127 : f32 to vector<8x16xf32>
    %280 = vector.broadcast %cst_128 : f32 to vector<8x16xf32>
    %281 = arith.select %278, %279, %280 : vector<8x16xi1>, vector<8x16xf32>
    %282 = vector.extract_strided_slice %7 {offsets = [0, 0], sizes = [8, 1], strides = [1, 1]} : vector<8x2xi32> to vector<8x1xi32>
    %283 = tpu.iota {dimensions = array<i32: 1>} : vector<8x8xi32>
    %284 = vector.broadcast %282 : vector<8x1xi32> to vector<8x8xi32>
    %285 = arith.cmpi eq, %283, %284 : vector<8x8xi32>
    %cst_129 = arith.constant 1.000000e+00 : f32
    %cst_130 = arith.constant 0.000000e+00 : f32
    %286 = vector.broadcast %cst_129 : f32 to vector<8x8xf32>
    %287 = vector.broadcast %cst_130 : f32 to vector<8x8xf32>
    %288 = arith.select %285, %286, %287 : vector<8x8xi1>, vector<8x8xf32>
    %289 = vector.extract_strided_slice %4 {offsets = [0, 0], sizes = [1, 8], strides = [1, 1]} : vector<2x8xi32> to vector<1x8xi32>
    %290 = tpu.iota {dimensions = array<i32: 0>} : vector<16x8xi32>
    %291 = vector.broadcast %289 : vector<1x8xi32> to vector<16x8xi32>
    %292 = arith.cmpi eq, %290, %291 : vector<16x8xi32>
    %cst_131 = arith.constant 1.000000e+00 : f32
    %cst_132 = arith.constant 0.000000e+00 : f32
    %293 = vector.broadcast %cst_131 : f32 to vector<16x8xf32>
    %294 = vector.broadcast %cst_132 : f32 to vector<16x8xf32>
    %295 = arith.select %292, %293, %294 : vector<16x8xi1>, vector<16x8xf32>
    %cst_133 = arith.constant dense<0.000000e+00> : vector<8x32xf32>
    %296 = tpu.matmul %274, %1, %cst_133 {dimension_numbers = #tpu.dot_dimension_numbers<[1], [0], [0], [1], [0, 0, 1, 1], [], []>} : vector<8x16xbf16>, vector<16x32xbf16>, vector<8x32xf32> -> vector<8x32xf32>
    %c0_134 = arith.constant 0 : index
    %c0_135 = arith.constant 0 : index
    %297 = vector.load %arg19[%c0_134, %c0_135] : memref<16x32xf32, #tpu.memory_space<vmem>>, vector<16x32xf32>
    %cst_136 = arith.constant dense<0.000000e+00> : vector<8x32xf32>
    %298 = tpu.matmul %281, %297, %cst_136 {dimension_numbers = #tpu.dot_dimension_numbers<[1], [0], [0], [1], [0, 0, 1, 1], [], []>} : vector<8x16xf32>, vector<16x32xf32>, vector<8x32xf32> -> vector<8x32xf32>
    %cst_137 = arith.constant dense<0.000000e+00> : vector<8x32xf32>
    %299 = tpu.matmul %288, %298, %cst_137 {dimension_numbers = #tpu.dot_dimension_numbers<[1], [0], [0], [1], [0, 0, 1, 1], [], []>} : vector<8x8xf32>, vector<8x32xf32>, vector<8x32xf32> -> vector<8x32xf32>
    %300 = tpu.concatenate %296, %299 in 1 : vector<8x32xf32>, vector<8x32xf32> -> vector<8x64xf32>
    %cst_138 = arith.constant dense<0.000000e+00> : vector<8x96xf32>
    %301 = tpu.matmul %300, %13, %cst_138 {dimension_numbers = #tpu.dot_dimension_numbers<[1], [0], [0], [1], [0, 0, 1, 1], [], []>} : vector<8x64xf32>, vector<64x96xf32>, vector<8x96xf32> -> vector<8x96xf32>
    %302 = vector.extract_strided_slice %301 {offsets = [0, 0], sizes = [8, 64], strides = [1, 1]} : vector<8x96xf32> to vector<8x64xf32>
    %303 = vector.broadcast %14 : vector<1x64xf32> to vector<8x64xf32>
    %304 = arith.addf %302, %303 : vector<8x64xf32>
    %305 = arith.negf %304 : vector<8x64xf32>
    %306 = math.exp %305 : vector<8x64xf32>
    %cst_139 = arith.constant 1.000000e+00 : f32
    %307 = vector.broadcast %cst_139 : f32 to vector<8x64xf32>
    %308 = arith.addf %307, %306 : vector<8x64xf32>
    %309 = arith.divf %307, %308 : vector<8x64xf32>
    %310 = vector.extract_strided_slice %309 {offsets = [0, 0], sizes = [8, 32], strides = [1, 1]} : vector<8x64xf32> to vector<8x32xf32>
    %311 = vector.extract_strided_slice %309 {offsets = [0, 32], sizes = [8, 32], strides = [1, 1]} : vector<8x64xf32> to vector<8x32xf32>
    %312 = arith.mulf %310, %299 : vector<8x32xf32>
    %cst_140 = arith.constant 1.000000e+00 : f32
    %313 = vector.broadcast %cst_140 : f32 to vector<8x32xf32>
    %314 = arith.subf %313, %310 : vector<8x32xf32>
    %315 = vector.extract_strided_slice %301 {offsets = [0, 64], sizes = [8, 32], strides = [1, 1]} : vector<8x96xf32> to vector<8x32xf32>
    %316 = arith.mulf %311, %299 : vector<8x32xf32>
    %cst_141 = arith.constant dense<0.000000e+00> : vector<8x32xf32>
    %317 = tpu.matmul %316, %15, %cst_141 {dimension_numbers = #tpu.dot_dimension_numbers<[1], [0], [0], [1], [0, 0, 1, 1], [], []>} : vector<8x32xf32>, vector<32x32xf32>, vector<8x32xf32> -> vector<8x32xf32>
    %318 = arith.addf %315, %317 : vector<8x32xf32>
    %319 = math.tanh %318 : vector<8x32xf32>
    %320 = arith.mulf %314, %319 : vector<8x32xf32>
    %321 = arith.addf %312, %320 : vector<8x32xf32>
    %c0_142 = arith.constant 0 : index
    %c0_143 = arith.constant 0 : index
    %322 = vector.load %arg19[%c0_142, %c0_143] : memref<16x32xf32, #tpu.memory_space<vmem>>, vector<16x32xf32>
    %cst_144 = arith.constant dense<0.000000e+00> : vector<16x32xf32>
    %323 = tpu.matmul %295, %321, %cst_144 {dimension_numbers = #tpu.dot_dimension_numbers<[1], [0], [0], [1], [0, 0, 1, 1], [], []>} : vector<16x8xf32>, vector<8x32xf32>, vector<16x32xf32> -> vector<16x32xf32>
    %324 = arith.addf %322, %323 : vector<16x32xf32>
    %c0_145 = arith.constant 0 : index
    %c0_146 = arith.constant 0 : index
    %325 = vector.load %arg19[%c0_145, %c0_146] : memref<16x32xf32, #tpu.memory_space<vmem>>, vector<16x32xf32>
    tpu.vector_store %arg19[%c0_145, %c0_146], %324 {strides = array<i32>} : memref<16x32xf32, #tpu.memory_space<vmem>>, vector<16x32xf32>,
    %c0_147 = arith.constant 0 : index
    %c0_148 = arith.constant 0 : index
    %326 = vector.load %arg18[%c0_147, %c0_148] : memref<16x32xf32, #tpu.memory_space<vmem>>, vector<16x32xf32>
    %c0_149 = arith.constant 0 : index
    %c0_150 = arith.constant 0 : index
    %327 = vector.load %arg19[%c0_149, %c0_150] : memref<16x32xf32, #tpu.memory_space<vmem>>, vector<16x32xf32>
    %328 = tpu.concatenate %326, %327 in 1 : vector<16x32xf32>, vector<16x32xf32> -> vector<16x64xf32>
    %cst_151 = arith.constant dense<0.000000e+00> : vector<16x32xf32>
    %329 = tpu.matmul %328, %16, %cst_151 {dimension_numbers = #tpu.dot_dimension_numbers<[1], [0], [0], [1], [0, 0, 1, 1], [], []>} : vector<16x64xf32>, vector<64x32xf32>, vector<16x32xf32> -> vector<16x32xf32>
    %330 = vector.broadcast %17 : vector<1x32xf32> to vector<16x32xf32>
    %331 = arith.addf %329, %330 : vector<16x32xf32>
    %c0_152 = arith.constant 0 : index
    %c0_153 = arith.constant 0 : index
    %332 = vector.load %arg17[%c0_152, %c0_153] : memref<16x32xf32, #tpu.memory_space<vmem>>, vector<16x32xf32>
    tpu.vector_store %arg17[%c0_152, %c0_153], %331 {strides = array<i32>} : memref<16x32xf32, #tpu.memory_space<vmem>>, vector<16x32xf32>,
    return
  }
}

</mosaic_0001>

<bundles_post_ra>
// kernel: tpu_custom_call.1
= control target key start
LH: loop header
LB: loop body
LE: loop exit
PB: predicated region body
PF: predicated region fallthrough
CT: control target
= control target key end

     0   :  { %s4199_s0 = inlined_call_operand.hbm [shape: s32[2,8], index: 0, kind: input, shape index: {}]   ;;  %s4200_s1 = inlined_call_operand.vmem [shape: s32[8,2], index: 1, kind: input, shape index: {}]   ;;  %s4201_s2 = inlined_call_operand.hbm [shape: s32[2,8], index: 2, kind: input, shape index: {}]   ;;  %s4202_s3 = inlined_call_operand.vmem [shape: s32[8,2], index: 3, kind: input, shape index: {}]   ;;  %s4203_s4 = inlined_call_operand.vmem [shape: s32[2,8], index: 4, kind: input, shape index: {}]   ;;  %s4204_s5 = inlined_call_operand.vmem [shape: s32[8,2], index: 5, kind: input, shape index: {}]   ;;  %s4205_s6 = inlined_call_operand.hbm [shape: f32[16,32], index: 6, kind: input, shape index: {}]   ;;  %s4206_s7 = inlined_call_operand.vmem [shape: f32[64,96], index: 7, kind: input, shape index: {}]   ;;  %s4207_s8 = inlined_call_operand.vmem [shape: f32[1,32], index: 8, kind: input, shape index: {}]   ;;  %s4208_s9 = inlined_call_operand.hbm [shape: f32[32,32], index: 9, kind: input, shape index: {}]   ;;  %s4209_s10 = inlined_call_operand.vmem [shape: f32[1,32], index: 10, kind: input, shape index: {}]   ;;  %s4210_s11 = inlined_call_operand.hbm [shape: f32[32,32], index: 11, kind: input, shape index: {}]   ;;  %s4211_s12 = inlined_call_operand.vmem [shape: f32[64,96], index: 12, kind: input, shape index: {}]   ;;  %s4212_s13 = inlined_call_operand.vmem [shape: f32[1,64], index: 13, kind: input, shape index: {}]   ;;  %s4213_s14 = inlined_call_operand.hbm [shape: f32[32,32], index: 14, kind: input, shape index: {}]   ;;  %s4214_s15 = inlined_call_operand.vmem [shape: f32[64,32], index: 15, kind: input, shape index: {}]   ;;  %s4215_s16 = inlined_call_operand.vmem [shape: f32[1,32], index: 16, kind: input, shape index: {}]   ;;  %s4216_s17 = inlined_call_operand.hbm [shape: f32[16,32], index: 17, kind: output, shape index: {}]  }
   0x1   :  { %4217 = sst [smem:[#allocation21_spill]] %s4199_s0 }
   0x2   :  { %4218 = sst [smem:[#allocation22_spill]] %s4200_s1 }
   0x3   :  { %22 = vsyncpa [#allocation5], 0 }
   0x4   :  { %23 = vsyncpa [#allocation8], 0 }
   0x5   :  { %24 = vsyncpa [#allocation11], 0 }
   0x6   :  { %25 = vsyncpa [#allocation14], 0 }
   0x7   :  { %26 = vsyncpa [#allocation6], 0  ;;  %s3468_s24 = smov [#allocation7]  }
   0x8   :  { %s45_s25 = sshll.u32 %s3468_s24, 4  ;;  %s46_s25 = int_to_ptr.vmem [resolvable:$true] %s45_s25 }
   0x9   :  { %s3326_s26 = scalar_lea.vmem %s46_s25, 32  ;;  %p3331_p1 = scmp.lt.s32.totalorder %s46_s25, %s46_s25 }
   0xa   :  { %p3327_p0 = scmp.ne.s32.totalorder %s46_s25, %s3326_s26  ;;  %p3332_p2 = scmp.lt.s32.totalorder %s3326_s26, %s3326_s26 }
   0xc   :  { %p3333_p3 = por %p3332_p2, %p3331_p1 }
   0xe   :  { %p3334_p4 = pnand %p3333_p3, %p3327_p0 }
  0x10   :  { %3337 = shalt.err (!%p3334_p4)
}
  0x11   :  { %48 = dma.hbm_to_vmem [thread:$0]  %s4201_s2, 32, %s46_s25, [#allocation8]  }
  0x12   :  { %s3469_s29 = smov [#allocation10]   ;;  %s3470_s30 = smov [#allocation4]  }
  0x13   :  { %s76_s0 = sshll.u32 %s3469_s29, 4  ;;  %s33_s18 = sshll.u32 %s3470_s30, 4  ;;  %s77_s0 = int_to_ptr.vmem [resolvable:$true] %s76_s0  ;;  %s34_s18 = int_to_ptr.vmem [resolvable:$true] %s33_s18 }
  0x14   :  { %s3346_s19 = scalar_lea.vmem %s77_s0, 512  ;;  %p3351_p6 = scmp.lt.s32.totalorder %s77_s0, %s77_s0 }
  0x15   :  { %p3347_p5 = scmp.ne.s32.totalorder %s77_s0, %s3346_s19  ;;  %p3352_p7 = scmp.lt.s32.totalorder %s3346_s19, %s3346_s19 }
  0x17   :  { %p3353_p8 = por %p3352_p7, %p3351_p6 }
  0x19   :  { %p3354_p9 = pnand %p3353_p8, %p3347_p5 }
  0x1b   :  { %3357 = shalt.err (!%p3354_p9)
}
  0x1c   :  { %s3471_s1 = smov 128   ;;  %s3472_s20 = smov 8  }
  0x1d   :  { %82 = dma.hbm_to_vmem [thread:$0]  %s4208_s9, 512, %s77_s0, [#allocation11], %s3471_s1, %s3471_s1, %s3472_s20  }
  0x1e   :  { %s3366_s2 = scalar_lea.vmem %s34_s18, 32  ;;  %p3371_p11 = scmp.lt.s32.totalorder %s34_s18, %s34_s18 }
  0x1f   :  { %p3367_p10 = scmp.ne.s32.totalorder %s34_s18, %s3366_s2  ;;  %p3372_p12 = scmp.lt.s32.totalorder %s3366_s2, %s3366_s2 }
  0x21   :  { %p3373_p13 = por %p3372_p12, %p3371_p11 }
  0x23   :  { %p3374_p0 = pnand %p3373_p13, %p3367_p10 }
  0x25   :  { %3377 = shalt.err (!%p3374_p0)
}
  0x26   :  { %s4219_s25 = sld [smem:[#allocation21_spill]]  ;;  %s3473_s26 = smov [#allocation9]  }
  0x27   :  { %s60_s27 = sshll.u32 %s3473_s26, 4  ;;  %s3474_s28 = smov [#allocation12]   ;;  %s61_s27 = int_to_ptr.vmem [resolvable:$true] %s60_s27 }
  0x28   :  { %s90_s29 = sshll.u32 %s3474_s28, 4  ;;  %s3386_s30 = scalar_lea.vmem %s61_s27, 256  ;;  %s91_s29 = int_to_ptr.vmem [resolvable:$true] %s90_s29 }
  0x29   :  { %p3387_p1 = scmp.ne.s32.totalorder %s61_s27, %s3386_s30  ;;  %p3391_p2 = scmp.lt.s32.totalorder %s61_s27, %s61_s27 }
  0x2a   :  { %p3392_p3 = scmp.lt.s32.totalorder %s3386_s30, %s3386_s30 }
  0x2c   :  { %36 = dma.hbm_to_vmem [thread:$0]  %s4219_s25, 32, %s34_s18, [#allocation5]  }
  0x2d   :  { %p3393_p4 = por %p3392_p3, %p3391_p2 }
  0x2f   :  { %p3394_p5 = pnand %p3393_p4, %p3387_p1 }
  0x31   :  { %3397 = shalt.err (!%p3394_p5)
}
  0x32   :  { %66 = dma.hbm_to_vmem [thread:$0]  %s4205_s6, 256, %s61_s27, [#allocation8], %s3471_s1, %s3471_s1, %s3472_s20  }
  0x33   :  { %s3406_s18 = scalar_lea.vmem %s91_s29, 512  ;;  %p3411_p7 = scmp.lt.s32.totalorder %s91_s29, %s91_s29 }
  0x34   :  { %p3407_p6 = scmp.ne.s32.totalorder %s91_s29, %s3406_s18  ;;  %p3412_p8 = scmp.lt.s32.totalorder %s3406_s18, %s3406_s18 }
  0x36   :  { %p3413_p9 = por %p3412_p8, %p3411_p7 }
  0x38   :  { %p3414_p10 = pnand %p3413_p9, %p3407_p6 }
  0x3a   :  { %3417 = shalt.err (!%p3414_p10)
}
  0x3b   :  { %96 = dma.hbm_to_vmem [thread:$0]  %s4210_s11, 512, %s91_s29, [#allocation11], %s3471_s1, %s3471_s1, %s3472_s20  }
  0x3c   :  { %s3475_s22 = smov [#allocation13]  }
  0x3d   :  { %s106_s2 = sshll.u32 %s3475_s22, 4  ;;  %s107_s2 = int_to_ptr.vmem [resolvable:$true] %s106_s2 }
  0x3e   :  { %s3426_s23 = scalar_lea.vmem %s107_s2, 512  ;;  %p3431_p12 = scmp.lt.s32.totalorder %s107_s2, %s107_s2 }
  0x3f   :  { %p3427_p11 = scmp.ne.s32.totalorder %s107_s2, %s3426_s23  ;;  %p3432_p13 = scmp.lt.s32.totalorder %s3426_s23, %s3426_s23 }
  0x41   :  { %p3433_p0 = por %p3432_p13, %p3431_p12 }
  0x43   :  { %p3434_p1 = pnand %p3433_p0, %p3427_p11 }
  0x45   :  { %3437 = shalt.err (!%p3434_p1)
}
  0x46   :  { %112 = dma.hbm_to_vmem [thread:$0]  %s4213_s14, 512, %s107_s2, [#allocation14], %s3471_s1, %s3471_s1, %s3472_s20  }
  0x47   :  { %3458 = dma.done.wait [#allocation5], 32  }
  0x48   :  { %3459 = vsyncadd [#allocation5], 4294967264 }
  0x49   :  { %3460 = dma.done.wait [#allocation8], 288  }
  0x4a   :  { %3461 = vsyncadd [#allocation8], 4294967008 }
  0x4b   :  { %3462 = dma.done.wait [#allocation11], 1024  }
  0x4c   :  { %3463 = vsyncadd [#allocation11], 4294966272 }
  0x4d   :  { %3464 = dma.done.wait [#allocation14], 512  }
  0x4e   :  { %3465 = vsyncadd [#allocation14], 4294966784  ;;  %v293_v0 = vlaneseq  ;;  %v3476_v1 = vmov 0.0   ;;  %vm185_vm0 = vcmask 261120   ;;  %v3614_v4 = vld [vmem:[%s4206_s7 + $0x18] sm:$0xff]  ;;  %v3619_v5 = vld [vmem:[%s4206_s7 + $0x10] sm:$0xff] }
  0x4f   :  { %2981 = vmatprep.subr.bf16.mxu1 %v3476_v1  ;;  %2970 = vmatprep.subr.mxu0 %v3614_v4  ;;  %v136_v6 = vld [vmem:[#allocation9] sm:$0xff]  ;;  %v137_v7 = vld [vmem:[#allocation9 + $0x8] sm:$0xff]  ;;  %v3634_v11 = vld [vmem:[#allocation7] sm:$0x3]  ;;  %vm304_vm1 = vcmask 64512   ;;  %v3477_v19 = vmov 0  }
  0x50   :  { %v3606_v2 = vshrl.u32 %v293_v0, 7  ;;  %2971 = vmatpush3.msra.mxu0 %v3614_v4  ;;  %v3629_v9 = vld [vmem:[%s4206_s7 + $0x8] sm:$0xff]  ;;  %v3631_v10 = vpack.c.bf16 %v137_v7, %v136_v6  ;;  %2978 = vmatprep.mubr.msk.f32.mxu0 %vm185_vm0, %v136_v6  ;;  %v3643_v13 = vld [vmem:[%s4206_s7] sm:$0xff]  ;;  %s3478_s18 = smov 64   ;;  %vm3479_vm4 = vmmov 0   ;;  %s4220_s21 = sld [smem:[#allocation22_spill]] }
  0x51   :  { %2972 = vmatprep.subr.mxu0 %v3619_v5  ;;  %v3668_v18 = vld [vmem:[%s4202_s3] sm:$0xff]  ;;  %3270 = vset.pattern.permute.xlu0 %v3477_v19  ;;  %v3685_v43 = vand.u32 127, %v293_v0  ;;  %vm347_vm6 = vcmask 130048   ;;  %v3710_v51 = vld [vmem:[#allocation10 + $0x18] sm:$0xff]  ;;  %v3725_v54 = vld [vmem:[#allocation10] sm:$0xff]  ;;  %vm544_vm9 = vcmask 523264  }
  0x52   :  { %v3609_v3 = vsub.s32 0, %v3606_v2  ;;  %v3623_v8 = vadd.s32 8, %v3606_v2  ;;  %2973 = vmatpush3.msra.mxu0 %v3619_v5  ;;  %2982 = vmatpush3.bf16.msra.mxu1 %v3631_v10  ;;  %v3713_v52 = vld [vmem:[#allocation10 + $0x10] sm:$0xff]  ;;  %v3719_v53 = vld [vmem:[#allocation10 + $0x8] sm:$0xff]  ;;  %v3760_v6 = vld [vmem:[%s4206_s7 + $0x30] sm:$0xff]  ;;  %s3481_s29 = smov 96  }
  0x53   :  { %2974 = vmatprep.subr.mxu0 %v3629_v9  ;;  %3018 = vmatprep.subr.mxu1 %v3476_v1  ;;  %v3732_v55 = vld [vmem:[%s4203_s4] sm:$0x3]  ;;  %v3755_v0 = vld [vmem:[%s4206_s7 + $0x38] sm:$0xff]  ;;  %s3483_s24 = smov [#allocation15]  }
  0x54   :  { %v299_v12 = vrot.slane %v3634_v11, %v3609_v3  ;;  %2975 = vmatpush3.msra.mxu0 %v3629_v9  ;;  %3271 = vset.pattern.permute.xlu1 %v3477_v19  ;;  %v331_v56 = vrot.slane %v3732_v55, %v3609_v3  ;;  %s2775_s11 = sshll.u32 %s3483_s24, 4  ;;  %s2776_s11 = int_to_ptr.vmem [resolvable:$true] %s2775_s11 }
  0x55   :  { %2976 = vmatprep.subr.mxu0 %v3643_v13  ;;  %2983 = vmatprep.mubr.msk.bf16.mxu1 %vm3479_vm4, %v3476_v1  ;;  %p3443_p3 = scmp.lt.s32.totalorder %s2776_s11, %s2776_s11 }
  0x56   :  { %vm301_vm2 = vcmp.eq.s32.totalorder %v3623_v8, %v299_v12  ;;  %vm300_vm3 = vcmp.eq.s32.totalorder %v3606_v2, %v299_v12  ;;  %2977 = vmatpush3.msra.mxu0 %v3643_v13  ;;  %v3678_v24 = vld [vmem:[%s4220_s21] sm:$0xff]  ;;  %vm332_vm8 = vcmp.eq.s32.totalorder %v3606_v2, %v331_v56 }
  0x57   :  { %v3652_v14 = vsel %vm301_vm2, 1.0, %v3476_v1  ;;  %v3655_v15 = vsel %vm300_vm3, 1.0, %v3476_v1  ;;  %2979 = vmatmul.mubr.msk.f32.vlgmr.msra.gmra.mxu0 %vm185_vm0, %v137_v7  ;;  %2987 = vmatprep.subr.mxu0 %v3476_v1  ;;  %v3738_v57 = vsel %vm332_vm8, 1.0, %v3476_v1  ;;  %v3767_v7 = vld [vmem:[%s4206_s7 + $0x28] sm:$0xff]  ;;  %v3774_v12 = vld [vmem:[%s4206_s7 + $0x20] sm:$0xff]  ;;  %s3480_s7 = smov 32  }
  0x58   :  { %v308_v16 = vsel %vm304_vm1, %v3652_v14, 0.0  ;;  %v305_v17 = vsel %vm304_vm1, %v3655_v15, 0.0  ;;  %2991 = vmatprep.mubr.msk.f32.mxu0 %vm3479_vm4, %v3476_v1 }
  0x59   :  { %309 = vadd.xlane.f32.xlu0 %v308_v16 }
  0x5d   :  { %306 = vadd.xlane.f32.xlu0 %v305_v17 }
  0x73   :  { %324 = vperm.xlu0 %3270, %v3668_v18  }
  0xe2   :  { %v310_v32 = vpop.xlane.xlu0 %309 }
  0xe6   :  { %v307_v40 = vpop.xlane.xlu0 %306 }
  0xee   :  { %v325_v44 = vpop.permute.xlu0 %324 }
  0xef   :  { %vm326_vm5 = vcmp.eq.s32.totalorder %v3685_v43, %v325_v44  ;;  %v3833_v44 = vld [vmem:[#allocation12] sm:$0xff] }
  0xf0   :  { %v3694_v46 = vsel %vm326_vm5, 1.0, %v3476_v1 }
 0x117   :  { %v2980_v20 = vpop.f32.mrf.mxu0 }
 0x118   :  { %3274 = vtanh.f32 %v2980_v20  ;;  %v2793_v25 = vmul.f32 -1.442695, %v2980_v20 }
 0x119   :  { %v258_v21 = vpop.f32.mrf.mxu0 }
 0x11a   :  { %3276 = vtanh.f32 %v258_v21  ;;  %v2792_v26 = vmul.f32 -1.442695, %v258_v21  ;;  %v3795_v21 = vld [vmem:[%s4204_s5] sm:$0xff] }
 0x11b   :  { %3278 = vpow2.f32 %v2793_v25 }
 0x11c   :  { %3280 = vpow2.f32 %v2792_v26 }
 0x125   :  { %v3275_v22 = vpop.eup %3274 }
 0x126   :  { %287 = vrot.lane.b32.xlu1 %v3275_v22, %s3478_s18 }
 0x127   :  { %v3277_v23 = vpop.eup %3276 }
 0x128   :  { %v3279_v27 = vpop.eup %3278 }
 0x129   :  { %v274_v28 = vadd.f32 1.0, %v3279_v27  ;;  %v3281_v29 = vpop.eup %3280 }
 0x12a   :  { %285 = vrot.lane.b32.xlu1 %v3277_v23, %s3478_s18  ;;  %v273_v30 = vadd.f32 1.0, %v3281_v29 }
 0x12b   :  { %3282 = vrcp.f32 %v274_v28 }
 0x12c   :  { %3284 = vrcp.f32 %v273_v30  ;;  %v3812_v30 = vld [vmem:[#allocation12 + $0x18] sm:$0xff] }
 0x12e   :  { %318 = vperm.xlu1 %3271, %v3678_v24  }
 0x138   :  { %v3283_v31 = vpop.eup %3282 }
 0x139   :  { %v280_v33 = vsub.f32 1.0, %v3283_v31  ;;  %v3285_v34 = vpop.eup %3284  ;;  %v3814_v31 = vld [vmem:[#allocation12 + $0x10] sm:$0xff] }
 0x13a   :  { %v279_v38 = vsub.f32 1.0, %v3285_v34 }
 0x198   :  { %v288_v35 = vpop.permute.xlu1 %287 }
 0x199   :  { %v292_v36 = vmul.f32 %v288_v35, %v280_v33  ;;  %v3827_v33 = vld [vmem:[%s4209_s10] ss:$0 sm:$0xff] }
 0x19b   :  { %v312_v37 = vmul.f32 %v310_v32, %v292_v36  ;;  %v3818_v32 = vld [vmem:[#allocation12 + $0x8] sm:$0xff] }
 0x19c   :  { %v286_v39 = vpop.permute.xlu1 %285 }
 0x19d   :  { %314 = vst.msk [vmem:[#allocation2 + $0x8] sm:$0xff] %vm185_vm0, %v312_v37  ;;  %v291_v41 = vmul.f32 %v286_v39, %v279_v38 }
 0x19f   :  { %v311_v42 = vmul.f32 %v307_v40, %v291_v41 }
 0x1a1   :  { %313 = vst.msk [vmem:[#allocation2] sm:$0xff] %vm185_vm0, %v311_v42 }
 0x1a4   :  { %v3688_v45 = vld [vmem:[#allocation2 + $0x8] sm:$0xff] }
 0x1a5   :  { %2988 = vmatpush3.msra.mxu0 %v3688_v45 }
 0x1a6   :  { %2989 = vmatprep.subr.mxu0 %v3476_v1 }
 0x1a8   :  { %v3696_v47 = vld [vmem:[#allocation2] sm:$0xff] }
 0x1a9   :  { %2990 = vmatpush3.msra.mxu0 %v3696_v47  ;;  %v319_v48 = vpop.permute.xlu1 %318 }
 0x1aa   :  { %2992 = vmatmul.mubr.msk.f32.vlgmr.msra.gmra.mxu0 %vm347_vm6, %v3694_v46  ;;  %vm320_vm7 = vcmp.eq.s32.totalorder %v3685_v43, %v319_v48  ;;  %2994 = vmatprep.subr.mxu0 %v3476_v1 }
 0x1ab   :  { %v3704_v49 = vsel %vm320_vm7, 1.0, %v3476_v1  ;;  %2996 = vmatprep.mubr.msk.f32.mxu0 %vm3479_vm4, %v3476_v1 }
 0x1ac   :  { %v322_v50 = vpack.c.bf16 %v3704_v49, %v3704_v49 }
 0x1ae   :  { %2984 = vmatmul.mubr.msk.bf16.vlgmr.msra.gmra.mxu1 %vm347_vm6, %v322_v50 }
 0x1af   :  { %3019 = vmatpush3.msra.mxu1 %v3710_v51  ;;  %3026 = vmatprep.mubr.msk.f32.mxu1 %vm3479_vm4, %v3476_v1 }
 0x1b0   :  { %3020 = vmatprep.subr.mxu1 %v3476_v1 }
 0x1b1   :  { %3021 = vmatpush3.msra.mxu1 %v3713_v52 }
 0x1b2   :  { %3022 = vmatprep.subr.mxu1 %v3476_v1 }
 0x1b3   :  { %3023 = vmatpush3.msra.mxu1 %v3719_v53 }
 0x1b4   :  { %3024 = vmatprep.subr.mxu1 %v3476_v1 }
 0x1b5   :  { %3025 = vmatpush3.msra.mxu1 %v3725_v54 }
 0x1b6   :  { %3029 = vmatprep.subr.mxu1 %v3476_v1 }
 0x26a   :  { %v3740_v58 = vpop.f32.mrf.mxu0 }
 0x26b   :  { %2995 = vmatpush3.msra.mxu0 %v3740_v58  ;;  %3027 = vmatmul.mubr.msk.f32.vlgmr.msra.gmra.mxu1 %vm185_vm0, %v3740_v58 }
 0x26c   :  { %v2993_v59 = vpop.f32.mrf.mxu0  ;;  %2997 = vmatmul.mubr.msk.f32.vlgmr.msra.gmra.mxu0 %vm304_vm1, %v3738_v57  ;;  %2999 = vmatprep.subr.mxu0 %v3476_v1 }
 0x26d   :  { %3015 = vmatprep.mubr.msk.f32.mxu0 %vm3479_vm4, %v3476_v1  ;;  %3031 = vmatprep.mubr.msk.f32.mxu1 %vm3479_vm4, %v3476_v1 }
 0x26e   :  { %v385_v60 = vpop.f32.mrf.mxu1  ;;  %3000 = vmatpush3.msra.mxu0 %v3755_v0 }
 0x26f   :  { %3001 = vmatprep.subr.mxu0 %v3476_v1 }
 0x270   :  { %v2985_v61 = vpop.f32.mrf.mxu1  ;;  %3002 = vmatpush3.msra.mxu0 %v3760_v6 }
 0x271   :  { %3003 = vmatprep.subr.mxu0 %v3476_v1 }
 0x272   :  { %v388_v62 = vpop.f32.mrf.mxu1  ;;  %3004 = vmatpush3.msra.mxu0 %v3767_v7 }
 0x273   :  { %3005 = vmatprep.subr.mxu0 %v3476_v1 }
 0x274   :  { %v2986_v63 = vpop.f32.mrf.mxu1  ;;  %3006 = vmatpush3.msra.mxu0 %v3774_v12 }
 0x275   :  { %3007 = vmatprep.subr.mxu0 %v3476_v1  ;;  %v3482_v63 = vmov 1  }
 0x276   :  { %3008 = vmatpush3.msra.mxu0 %v3614_v4  ;;  %3273 = vset.pattern.permute.xlu0 %v3482_v63 }
 0x277   :  { %3009 = vmatprep.subr.mxu0 %v3476_v1 }
 0x278   :  { %3010 = vmatpush3.msra.mxu0 %v3619_v5 }
 0x279   :  { %3011 = vmatprep.subr.mxu0 %v3476_v1 }
 0x27a   :  { %3012 = vmatpush3.msra.mxu0 %v3629_v9 }
 0x27b   :  { %3013 = vmatprep.subr.mxu0 %v3476_v1 }
 0x27c   :  { %3014 = vmatpush3.msra.mxu0 %v3643_v13 }
 0x27d   :  { %3039 = vmatprep.subr.mxu0 %v3476_v1 }
 0x32b   :  { %v700_v16 = vpop.f32.mrf.mxu1 }
 0x32c   :  { %v3788_v17 = vpop.f32.mrf.mxu0 }
 0x32d   :  { %540 = vrot.lane.b32.xlu1 %v3788_v17, %s3480_s7  ;;  %v3028_v19 = vpop.f32.mrf.mxu1 }
 0x32e   :  { %v2998_v20 = vpop.f32.mrf.mxu0 }
 0x331   :  { %335 = vperm.xlu1 %3271, %v3795_v21  }
 0x335   :  { %3272 = vset.pattern.permute.xlu1 %v3482_v63 }
 0x39f   :  { %v541_v22 = vpop.permute.xlu1 %540 }
 0x3a0   :  { %v543_v23 = vsel %vm185_vm0, %v385_v60, %v541_v22 }
 0x3a1   :  { %3016 = vmatmul.mubr.msk.f32.vlgmr.msra.gmra.mxu0 %vm544_vm9, %v543_v23 }
 0x3a2   :  { %3047 = vmatprep.mubr.msk.f32.mxu0 %vm3479_vm4, %v3476_v1  ;;  %3040 = vmatpush3.msra.mxu0 %v3812_v30 }
 0x3a3   :  { %3041 = vmatprep.subr.mxu0 %v3476_v1 }
 0x3a4   :  { %3042 = vmatpush3.msra.mxu0 %v3814_v31 }
 0x3a5   :  { %3043 = vmatprep.subr.mxu0 %v3476_v1 }
 0x3a6   :  { %3044 = vmatpush3.msra.mxu0 %v3818_v32 }
 0x3a7   :  { %3045 = vmatprep.subr.mxu0 %v3476_v1 }
 0x3a8   :  { %3046 = vmatpush3.msra.mxu0 %v3833_v44 }
 0x3a9   :  { %3061 = vmatprep.subr.mxu0 %v3476_v1 }
 0x3ac   :  { %v336_v27 = vpop.permute.xlu1 %335 }
 0x3ad   :  { %vm337_vm10 = vcmp.eq.s32.totalorder %v3685_v43, %v336_v27 }
 0x3ae   :  { %v3805_v29 = vsel %vm337_vm10, 1.0, %v3476_v1 }
 0x461   :  { %v614_v25 = vpop.f32.mrf.mxu0 }
 0x462   :  { %705 = vrot.lane.b32.xlu1 %v614_v25, %s3481_s29 }
 0x463   :  { %v3017_v26 = vpop.f32.mrf.mxu0 }
 0x4d4   :  { %v706_v28 = vpop.permute.xlu1 %705 }
 0x4d5   :  { %3030 = vmatpush3.msra.mxu1 %v706_v28 }
 0x4d6   :  { %3032 = vmatmul.mubr.msk.f32.vlgmr.msra.gmra.mxu1 %vm304_vm1, %v3805_v29  ;;  %3034 = vmatprep.subr.mxu1 %v3476_v1 }
 0x4d7   :  { %3036 = vmatprep.mubr.msk.f32.mxu1 %vm3479_vm4, %v3476_v1 }
 0x596   :  { %v777_v34 = vpop.f32.mrf.mxu1 }
 0x597   :  { %v778_v35 = vadd.f32 %v777_v34, %v700_v16 }
 0x598   :  { %v3033_v36 = vpop.f32.mrf.mxu1 }
 0x599   :  { %v787_v37 = vadd.f32 %v3827_v33, %v778_v35 }
 0x59b   :  { %v2803_v38 = vmul.f32 -1.442695, %v787_v37 }
 0x59d   :  { %3286 = vpow2.f32 %v2803_v38 }
 0x5aa   :  { %v3287_v39 = vpop.eup %3286 }
 0x5ab   :  { %v791_v40 = vadd.f32 1.0, %v3287_v39  ;;  %v3912_v39 = vsub.s32 1, %v3606_v2 }
 0x5ad   :  { %3288 = vrcp.f32 %v791_v40  ;;  %v1051_v40 = vrot.slane %v3732_v55, %v3912_v39 }
 0x5af   :  { %vm1052_vm15 = vcmp.eq.s32.totalorder %v3606_v2, %v1051_v40 }
 0x5ba   :  { %v3289_v41 = vpop.eup %3288 }
 0x5bb   :  { %v794_v42 = vmul.f32 %v3289_v41, %v3740_v58  ;;  %v1053_v41 = vsel %vm1052_vm15, 1.0, %v3476_v1 }
 0x5bd   :  { %3035 = vmatpush3.msra.mxu1 %v794_v42 }
 0x5be   :  { %3037 = vmatmul.mubr.msk.f32.vlgmr.msra.gmra.mxu1 %vm304_vm1, %v3738_v57  ;;  %v3841_v57 = vld [vmem:[#allocation4] sm:$0x3] }
 0x5bf   :  { %v342_v61 = vrot.slane %v3841_v57, %v3609_v3  ;;  %v3854_v3 = vld [vmem:[%s4207_s8] ss:$0 sm:$0xff] }
 0x5c0   :  { %v624_v19 = vadd.f32 %v3854_v3, %v614_v25 }
 0x5c1   :  { %vm343_vm11 = vcmp.eq.s32.totalorder %v3606_v2, %v342_v61  ;;  %vm344_vm12 = vcmp.eq.s32.totalorder %v3623_v8, %v342_v61 }
 0x5c2   :  { %v345_v62 = vsel %vm343_vm11, 1.0, %v3476_v1  ;;  %v2799_v20 = vmul.f32 -1.442695, %v624_v19  ;;  %v346_v35 = vsel %vm344_vm12, 1.0, %v3476_v1 }
 0x5c3   :  { %3052 = vmatprep.mubr.msk.f32.mxu1 %vm304_vm1, %v345_v62 }
 0x67e   :  { %v861_v48 = vpop.f32.mrf.mxu1 }
 0x67f   :  { %3048 = vmatmul.mubr.msk.f32.vlgmr.msra.gmra.mxu0 %vm185_vm0, %v861_v48 }
 0x680   :  { %v3038_v50 = vpop.f32.mrf.mxu1  ;;  %3065 = vmatprep.mubr.msk.f32.mxu0 %vm3479_vm4, %v3476_v1 }
 0x73f   :  { %v934_v56 = vpop.f32.mrf.mxu0 }
 0x740   :  { %941 = vrot.lane.b32.xlu1 %v934_v56, %s3478_s18 }
 0x741   :  { %v3049_v58 = vpop.f32.mrf.mxu0 }
 0x7b2   :  { %v942_v59 = vpop.permute.xlu1 %941 }
 0x7b3   :  { %v944_v60 = vadd.f32 %v942_v59, %v614_v25 }
 0x7b5   :  { %3290 = vtanh.f32 %v944_v60 }
 0x7b6   :  { %3292 = vpow2.f32 %v2799_v20 }
 0x7c2   :  { %v3291_v16 = vpop.eup %3290 }
 0x7c3   :  { %947 = vrot.lane.b32.xlu1 %v3291_v16, %s3478_s18  ;;  %v3293_v22 = vpop.eup %3292 }
 0x7c4   :  { %v628_v23 = vadd.f32 1.0, %v3293_v22 }
 0x7c6   :  { %3294 = vrcp.f32 %v628_v23 }
 0x7c7   :  { %1044 = vperm.xlu1 %3272, %v3668_v18  }
 0x7cb   :  { %1038 = vperm.xlu1 %3272, %v3678_v24  }
 0x7d3   :  { %v3295_v26 = vpop.eup %3294 }
 0x7d4   :  { %v939_v27 = vsub.f32 1.0, %v3295_v26  ;;  %v938_v34 = vmul.f32 %v3295_v26, %v3788_v17 }
 0x835   :  { %v948_v28 = vpop.permute.xlu1 %947 }
 0x836   :  { %v950_v18 = vmul.f32 %v948_v28, %v939_v27  ;;  %v1062_v27 = vrot.slane %v3841_v57, %v3912_v39 }
 0x838   :  { %v951_v24 = vadd.f32 %v950_v18, %v938_v34  ;;  %vm1063_vm3 = vcmp.eq.s32.totalorder %v3606_v2, %v1062_v27  ;;  %vm1064_vm5 = vcmp.eq.s32.totalorder %v3623_v8, %v1062_v27 }
 0x839   :  { %v1065_v28 = vsel %vm1063_vm3, 1.0, %v3476_v1  ;;  %v1066_v34 = vsel %vm1064_vm5, 1.0, %v3476_v1 }
 0x83a   :  { %3050 = vmatprep.subr.mxu1 %v951_v24  ;;  %v1746_v18 = vsel %vm304_vm1, %v1066_v34, 0.0 }
 0x83b   :  { %3051 = vmatpush3.msra.mxu1 %v951_v24 }
 0x83c   :  { %3053 = vmatmul.mubr.msk.f32.vlgmr.msra.gmra.mxu1 %vm304_vm1, %v346_v35  ;;  %3055 = vmatprep.subr.bf16.mxu1 %v3476_v1  ;;  %v1743_v35 = vsel %vm304_vm1, %v1065_v28, 0.0 }
 0x83d   :  { %3056 = vmatpush3.bf16.msra.mxu1 %v3631_v10  ;;  %3057 = vmatprep.mubr.msk.bf16.mxu1 %vm3479_vm4, %v3476_v1 }
 0x83e   :  { %3073 = vmatprep.subr.mxu1 %v3476_v1 }
 0x842   :  { %v1045_v17 = vpop.permute.xlu1 %1044 }
 0x843   :  { %vm1046_vm14 = vcmp.eq.s32.totalorder %v3685_v43, %v1045_v17 }
 0x846   :  { %v1039_v25 = vpop.permute.xlu1 %1038 }
 0x847   :  { %vm1040_vm13 = vcmp.eq.s32.totalorder %v3685_v43, %v1039_v25 }
 0x848   :  { %v3868_v36 = vsel %vm1040_vm13, 1.0, %v3476_v1 }
 0x849   :  { %v1042_v37 = vpack.c.bf16 %v3868_v36, %v3868_v36 }
 0x84b   :  { %3058 = vmatmul.mubr.msk.bf16.vlgmr.msra.gmra.mxu1 %vm347_vm6, %v1042_v37 }
 0x84c   :  { %3074 = vmatpush3.msra.mxu1 %v3755_v0  ;;  %3089 = vmatprep.mubr.msk.f32.mxu1 %vm3479_vm4, %v3476_v1 }
 0x84d   :  { %3075 = vmatprep.subr.mxu1 %v3476_v1 }
 0x84e   :  { %3076 = vmatpush3.msra.mxu1 %v3760_v6 }
 0x84f   :  { %3077 = vmatprep.subr.mxu1 %v3476_v1 }
 0x850   :  { %3078 = vmatpush3.msra.mxu1 %v3767_v7 }
 0x851   :  { %3079 = vmatprep.subr.mxu1 %v3476_v1 }
 0x852   :  { %3080 = vmatpush3.msra.mxu1 %v3774_v12 }
 0x853   :  { %3081 = vmatprep.subr.mxu1 %v3476_v1 }
 0x854   :  { %3082 = vmatpush3.msra.mxu1 %v3614_v4 }
 0x855   :  { %3083 = vmatprep.subr.mxu1 %v3476_v1 }
 0x856   :  { %3084 = vmatpush3.msra.mxu1 %v3619_v5 }
 0x857   :  { %3085 = vmatprep.subr.mxu1 %v3476_v1 }
 0x858   :  { %3086 = vmatpush3.msra.mxu1 %v3629_v9  ;;  %v3899_v9 = vsel %vm1046_vm14, 1.0, %v3476_v1 }
 0x859   :  { %3087 = vmatprep.subr.mxu1 %v3476_v1 }
 0x85a   :  { %3088 = vmatpush3.msra.mxu1 %v3643_v13 }
 0x85b   :  { %3108 = vmatprep.subr.mxu1 %v3476_v1 }
 0x8fc   :  { %v3054_v0 = vpop.f32.mrf.mxu1 }
 0x8fd   :  { %v1034_v6 = vadd.f32 %v3054_v0, %v3688_v45 }
 0x8fe   :  { %v1024_v7 = vpop.f32.mrf.mxu1 }
 0x8ff   :  { %1036 = vst.msk [vmem:[#allocation2 + $0x8] sm:$0xff] %vm185_vm0, %v1034_v6  ;;  %v1033_v4 = vadd.f32 %v1024_v7, %v3696_v47 }
 0x901   :  { %1035 = vst.msk [vmem:[#allocation2] sm:$0xff] %vm185_vm0, %v1033_v4 }
 0x906   :  { %v3896_v5 = vld [vmem:[#allocation2 + $0x8] sm:$0xff] }
 0x907   :  { %3062 = vmatpush3.msra.mxu0 %v3896_v5 }
 0x908   :  { %3063 = vmatprep.subr.mxu0 %v3476_v1  ;;  %v3903_v13 = vld [vmem:[#allocation2] sm:$0xff] }
 0x909   :  { %3064 = vmatpush3.msra.mxu0 %v3903_v13 }
 0x90a   :  { %3066 = vmatmul.mubr.msk.f32.vlgmr.msra.gmra.mxu0 %vm347_vm6, %v3899_v9  ;;  %3068 = vmatprep.subr.mxu0 %v3476_v1 }
 0x90b   :  { %3070 = vmatprep.mubr.msk.f32.mxu0 %vm3479_vm4, %v3476_v1  ;;  %v1104_v45 = vpop.f32.mrf.mxu1 }
 0x90d   :  { %v3059_v47 = vpop.f32.mrf.mxu1 }
 0x90f   :  { %v1107_v12 = vpop.f32.mrf.mxu1 }
 0x911   :  { %v3060_v38 = vpop.f32.mrf.mxu1 }
 0x9ca   :  { %v1181_v42 = vpop.f32.mrf.mxu0 }
 0x9cb   :  { %3069 = vmatpush3.msra.mxu0 %v1181_v42 }
 0x9cc   :  { %v3067_v48 = vpop.f32.mrf.mxu0  ;;  %3071 = vmatmul.mubr.msk.f32.vlgmr.msra.gmra.mxu0 %vm304_vm1, %v1053_v41  ;;  %3092 = vmatprep.subr.mxu0 %v3476_v1 }
 0x9cd   :  { %3093 = vmatpush3.msra.mxu0 %v3710_v51  ;;  %3100 = vmatprep.mubr.msk.f32.mxu0 %vm3479_vm4, %v3476_v1 }
 0x9ce   :  { %3094 = vmatprep.subr.mxu0 %v3476_v1 }
 0x9cf   :  { %3095 = vmatpush3.msra.mxu0 %v3713_v52 }
 0x9d0   :  { %3096 = vmatprep.subr.mxu0 %v3476_v1 }
 0x9d1   :  { %3097 = vmatpush3.msra.mxu0 %v3719_v53 }
 0x9d2   :  { %3098 = vmatprep.subr.mxu0 %v3476_v1 }
 0x9d3   :  { %3099 = vmatpush3.msra.mxu0 %v3725_v54 }
 0x9d4   :  { %3101 = vmatmul.mubr.msk.f32.vlgmr.msra.gmra.mxu0 %vm185_vm0, %v1181_v42  ;;  %3103 = vmatprep.subr.mxu0 %v3476_v1 }
 0x9d5   :  { %3105 = vmatprep.mubr.msk.f32.mxu0 %vm3479_vm4, %v3476_v1 }
 0xa8c   :  { %v3933_v51 = vpop.f32.mrf.mxu0 }
 0xa8d   :  { %1259 = vrot.lane.b32.xlu1 %v3933_v51, %s3480_s7 }
 0xa8e   :  { %v3072_v52 = vpop.f32.mrf.mxu0 }
 0xa91   :  { %1055 = vperm.xlu1 %3272, %v3795_v21  }
 0xa94   :  { %v1412_v53 = vpop.f32.mrf.mxu0 }
 0xa96   :  { %v3102_v55 = vpop.f32.mrf.mxu0 }
 0xaff   :  { %v1260_v50 = vpop.permute.xlu1 %1259 }
 0xb00   :  { %v1262_v54 = vsel %vm185_vm0, %v1104_v45, %v1260_v50 }
 0xb01   :  { %3090 = vmatmul.mubr.msk.f32.vlgmr.msra.gmra.mxu1 %vm544_vm9, %v1262_v54 }
 0xb02   :  { %3110 = vmatprep.mubr.msk.f32.mxu1 %vm3479_vm4, %v3476_v1 }
 0xb0c   :  { %v1056_v59 = vpop.permute.xlu1 %1055 }
 0xb0d   :  { %vm1057_vm2 = vcmp.eq.s32.totalorder %v3685_v43, %v1056_v59 }
 0xb0e   :  { %v3945_v21 = vsel %vm1057_vm2, 1.0, %v3476_v1 }
 0xbc1   :  { %v1332_v56 = vpop.f32.mrf.mxu1 }
 0xbc2   :  { %1417 = vrot.lane.b32.xlu1 %v1332_v56, %s3481_s29  ;;  %v1336_v57 = vadd.f32 %v3854_v3, %v1332_v56  ;;  %v1755_v3 = vpack.c.bf16 %v3899_v9, %v3899_v9 }
 0xbc3   :  { %v3091_v58 = vpop.f32.mrf.mxu1 }
 0xbc4   :  { %v2812_v17 = vmul.f32 -1.442695, %v1336_v57 }
 0xc34   :  { %v1418_v60 = vpop.permute.xlu1 %1417 }
 0xc35   :  { %3104 = vmatpush3.msra.mxu0 %v1418_v60  ;;  %v169_v60 = vld [vmem:[%s4211_s12 + $0x30] sm:$0xff] }
 0xc36   :  { %3106 = vmatmul.mubr.msk.f32.vlgmr.msra.gmra.mxu0 %vm304_vm1, %v3945_v21  ;;  %3113 = vmatprep.subr.mxu0 %v3476_v1 }
 0xc37   :  { %3114 = vmatpush3.msra.mxu0 %v3812_v30  ;;  %3121 = vmatprep.mubr.msk.f32.mxu0 %vm3479_vm4, %v3476_v1 }
 0xc38   :  { %3115 = vmatprep.subr.mxu0 %v3476_v1 }
 0xc39   :  { %3116 = vmatpush3.msra.mxu0 %v3814_v31 }
 0xc3a   :  { %3117 = vmatprep.subr.mxu0 %v3476_v1 }
 0xc3b   :  { %3118 = vmatpush3.msra.mxu0 %v3818_v32 }
 0xc3c   :  { %3119 = vmatprep.subr.mxu0 %v3476_v1 }
 0xc3d   :  { %3120 = vmatpush3.msra.mxu0 %v3833_v44 }
 0xc3e   :  { %3135 = vmatprep.subr.mxu0 %v3476_v1 }
 0xcf6   :  { %v1489_v43 = vpop.f32.mrf.mxu0 }
 0xcf7   :  { %v1490_v61 = vadd.f32 %v1489_v43, %v1412_v53  ;;  %v167_v43 = vld [vmem:[%s4211_s12 + $0x20] sm:$0xff] }
 0xcf8   :  { %v3107_v30 = vpop.f32.mrf.mxu0 }
 0xcf9   :  { %v1493_v62 = vadd.f32 %v3827_v33, %v1490_v61  ;;  %v166_v61 = vld [vmem:[%s4211_s12 + $0x18] sm:$0xff]  ;;  %v165_v30 = vld [vmem:[%s4211_s12 + $0x10] sm:$0xff] }
 0xcfb   :  { %v2815_v63 = vmul.f32 -1.442695, %v1493_v62  ;;  %v164_v62 = vld [vmem:[%s4211_s12 + $0x8] sm:$0xff] }
 0xcfd   :  { %3296 = vpow2.f32 %v2815_v63  ;;  %v163_v63 = vld [vmem:[%s4211_s12] sm:$0xff] }
 0xd0a   :  { %v3297_v16 = vpop.eup %3296 }
 0xd0b   :  { %v1497_v19 = vadd.f32 1.0, %v3297_v16 }
 0xd0d   :  { %3298 = vrcp.f32 %v1497_v19 }
 0xd1a   :  { %v3299_v31 = vpop.eup %3298 }
 0xd1b   :  { %v1500_v20 = vmul.f32 %v3299_v31, %v1181_v42 }
 0xd1d   :  { %3109 = vmatpush3.msra.mxu1 %v1500_v20 }
 0xd1e   :  { %3111 = vmatmul.mubr.msk.f32.vlgmr.msra.gmra.mxu1 %vm304_vm1, %v1053_v41 }
 0xd1f   :  { %3126 = vmatprep.mubr.msk.f32.mxu1 %vm304_vm1, %v1065_v28 }
 0xdde   :  { %v1567_v32 = vpop.f32.mrf.mxu1 }
 0xddf   :  { %3122 = vmatmul.mubr.msk.f32.vlgmr.msra.gmra.mxu0 %vm185_vm0, %v1567_v32  ;;  %v2218_v32 = vpack.c.bf16 %v3694_v46, %v3694_v46  ;;  %v4074_v46 = vld [vmem:[#allocation13 + $0x10] sm:$0xff] }
 0xde0   :  { %v3112_v44 = vpop.f32.mrf.mxu1  ;;  %3139 = vmatprep.mubr.msk.f32.mxu0 %vm3479_vm4, %v3476_v1 }
 0xde1   :  { %v4078_v44 = vld [vmem:[#allocation13 + $0x8] sm:$0xff] }
 0xe9f   :  { %v1640_v22 = vpop.f32.mrf.mxu0 }
 0xea0   :  { %1647 = vrot.lane.b32.xlu0 %v1640_v22, %s3478_s18  ;;  %v4082_v22 = vld [vmem:[#allocation13] sm:$0xff] }
 0xea1   :  { %v3123_v33 = vpop.f32.mrf.mxu0 }
 0xea2   :  { %v4090_v33 = vld [vmem:[%s4212_s13] ss:$0 sm:$0xff] }
 0xebf   :  { %1747 = vadd.xlane.f32.xlu0 %v1746_v18 }
 0xf12   :  { %v1648_v23 = vpop.permute.xlu0 %1647 }
 0xf13   :  { %v1650_v26 = vadd.f32 %v1648_v23, %v1332_v56 }
 0xf15   :  { %3300 = vtanh.f32 %v1650_v26 }
 0xf16   :  { %3302 = vpow2.f32 %v2812_v17 }
 0xf22   :  { %v3301_v24 = vpop.eup %3300 }
 0xf23   :  { %1653 = vrot.lane.b32.xlu1 %v3301_v24, %s3478_s18  ;;  %v3303_v25 = vpop.eup %3302 }
 0xf24   :  { %v1340_v37 = vadd.f32 1.0, %v3303_v25 }
 0xf26   :  { %3304 = vrcp.f32 %v1340_v37 }
 0xf33   :  { %v3305_v0 = vpop.eup %3304 }
 0xf34   :  { %v1645_v6 = vsub.f32 1.0, %v3305_v0  ;;  %v1644_v4 = vmul.f32 %v3305_v0, %v3933_v51 }
 0xf47   :  { %1744 = vadd.xlane.f32.xlu1 %v1743_v35 }
 0xf48   :  { %v1748_v51 = vpop.xlane.xlu0 %1747 }
 0xf95   :  { %v1654_v7 = vpop.permute.xlu1 %1653 }
 0xf96   :  { %v1656_v45 = vmul.f32 %v1654_v7, %v1645_v6 }
 0xf98   :  { %v1657_v47 = vadd.f32 %v1656_v45, %v1644_v4 }
 0xf9a   :  { %3124 = vmatprep.subr.mxu1 %v1657_v47 }
 0xf9b   :  { %3125 = vmatpush3.msra.mxu1 %v1657_v47  ;;  %v1759_v47 = vrot.slane %v3634_v11, %v3912_v39 }
 0xf9c   :  { %3127 = vmatmul.mubr.msk.f32.vlgmr.msra.gmra.mxu1 %vm304_vm1, %v1066_v34  ;;  %3129 = vmatprep.subr.bf16.mxu1 %v3476_v1 }
 0xf9d   :  { %3130 = vmatpush3.bf16.msra.mxu1 %v3631_v10  ;;  %3131 = vmatprep.mubr.msk.bf16.mxu1 %vm3479_vm4, %v3476_v1  ;;  %vm1760_vm7 = vcmp.eq.s32.totalorder %v3606_v2, %v1759_v47  ;;  %vm1761_vm8 = vcmp.eq.s32.totalorder %v3623_v8, %v1759_v47 }
 0xf9e   :  { %3147 = vmatprep.subr.mxu1 %v3476_v1 }
 0xfa0   :  { %3132 = vmatmul.mubr.msk.bf16.vlgmr.msra.gmra.mxu1 %vm347_vm6, %v1755_v3  ;;  %v1762_v3 = vsel %vm1760_vm7, 1.0, %v3476_v1 }
 0xfa1   :  { %3163 = vmatprep.mubr.msk.f32.mxu1 %vm3479_vm4, %v3476_v1 }
 0xfd0   :  { %v1745_v55 = vpop.xlane.xlu1 %1744 }
0x105c   :  { %v3128_v12 = vpop.f32.mrf.mxu1 }
0x105d   :  { %v1740_v38 = vadd.f32 %v3128_v12, %v3896_v5 }
0x105e   :  { %v1730_v40 = vpop.f32.mrf.mxu1 }
0x105f   :  { %1742 = vst.msk [vmem:[#allocation2 + $0x8] sm:$0xff] %vm185_vm0, %v1740_v38  ;;  %v1739_v41 = vadd.f32 %v1730_v40, %v3903_v13 }
0x1060   :  { %v1801_v42 = vpop.f32.mrf.mxu1 }
0x1061   :  { %1741 = vst.msk [vmem:[#allocation2] sm:$0xff] %vm185_vm0, %v1739_v41 }
0x1062   :  { %v3133_v48 = vpop.f32.mrf.mxu1 }
0x1064   :  { %v1804_v9 = vpop.f32.mrf.mxu1 }
0x1065   :  { %v1763_v9 = vsel %vm1761_vm8, 1.0, %v3476_v1 }
0x1066   :  { %v3134_v52 = vpop.f32.mrf.mxu1  ;;  %v3993_v53 = vld [vmem:[#allocation2 + $0x8] sm:$0xff] }
0x1067   :  { %v1752_v50 = vmul.f32 %v3993_v53, %v1748_v51 }
0x1068   :  { %v3996_v54 = vld [vmem:[#allocation2] sm:$0xff] }
0x1069   :  { %1754 = vst.msk [vmem:[#allocation3 + $0x8] sm:$0xff] %vm185_vm0, %v1752_v50  ;;  %v1751_v5 = vmul.f32 %v3996_v54, %v1745_v55 }
0x106b   :  { %1753 = vst.msk [vmem:[#allocation3] sm:$0xff] %vm185_vm0, %v1751_v5 }
0x1070   :  { %v4001_v13 = vld [vmem:[#allocation3 + $0x8] sm:$0xff] }
0x1071   :  { %3136 = vmatpush3.msra.mxu0 %v4001_v13 }
0x1072   :  { %3137 = vmatprep.subr.mxu0 %v3476_v1  ;;  %v4005_v56 = vld [vmem:[#allocation3] sm:$0xff] }
0x1073   :  { %3138 = vmatpush3.msra.mxu0 %v4005_v56 }
0x1074   :  { %3140 = vmatmul.mubr.msk.f32.vlgmr.msra.gmra.mxu0 %vm347_vm6, %v3868_v36  ;;  %3142 = vmatprep.subr.mxu0 %v3476_v1  ;;  %v170_v36 = vld [vmem:[%s4211_s12 + $0x38] sm:$0xff] }
0x1075   :  { %3144 = vmatprep.mubr.msk.f32.mxu0 %vm3479_vm4, %v3476_v1  ;;  %3148 = vmatpush3.msra.mxu1 %v170_v36 }
0x1076   :  { %3149 = vmatprep.subr.mxu1 %v3476_v1 }
0x1077   :  { %3150 = vmatpush3.msra.mxu1 %v169_v60 }
0x1078   :  { %3151 = vmatprep.subr.mxu1 %v3476_v1 }
0x1134   :  { %v1878_v58 = vpop.f32.mrf.mxu0 }
0x1135   :  { %3143 = vmatpush3.msra.mxu0 %v1878_v58 }
0x1136   :  { %v3141_v59 = vpop.f32.mrf.mxu0  ;;  %3145 = vmatmul.mubr.msk.f32.vlgmr.msra.gmra.mxu0 %vm304_vm1, %v3945_v21  ;;  %3166 = vmatprep.subr.mxu0 %v3476_v1  ;;  %v168_v21 = vld [vmem:[%s4211_s12 + $0x28] sm:$0xff] }
0x1137   :  { %3174 = vmatprep.mubr.msk.f32.mxu0 %vm3479_vm4, %v3476_v1  ;;  %3152 = vmatpush3.msra.mxu1 %v168_v21 }
0x1138   :  { %3153 = vmatprep.subr.mxu1 %v3476_v1 }
0x1139   :  { %3154 = vmatpush3.msra.mxu1 %v167_v43 }
0x113a   :  { %3155 = vmatprep.subr.mxu1 %v3476_v1 }
0x113b   :  { %3156 = vmatpush3.msra.mxu1 %v166_v61 }
0x113c   :  { %3157 = vmatprep.subr.mxu1 %v3476_v1 }
0x113d   :  { %3158 = vmatpush3.msra.mxu1 %v165_v30 }
0x113e   :  { %3159 = vmatprep.subr.mxu1 %v3476_v1 }
0x113f   :  { %3160 = vmatpush3.msra.mxu1 %v164_v62 }
0x1140   :  { %3161 = vmatprep.subr.mxu1 %v3476_v1 }
0x1141   :  { %3162 = vmatpush3.msra.mxu1 %v163_v63 }
0x1142   :  { %3182 = vmatprep.subr.bf16.mxu1 %v3476_v1 }
0x11f6   :  { %v4050_v16 = vpop.f32.mrf.mxu0 }
0x11f7   :  { %1953 = vrot.lane.b32.xlu0 %v4050_v16, %s3480_s7 }
0x11f8   :  { %v3146_v19 = vpop.f32.mrf.mxu0 }
0x1269   :  { %v1954_v31 = vpop.permute.xlu0 %1953 }
0x126a   :  { %v1956_v20 = vsel %vm185_vm0, %v1801_v42, %v1954_v31 }
0x126b   :  { %3164 = vmatmul.mubr.msk.f32.vlgmr.msra.gmra.mxu1 %vm544_vm9, %v1956_v20 }
0x126c   :  { %3183 = vmatpush3.bf16.msra.mxu1 %v3631_v10  ;;  %3184 = vmatprep.mubr.msk.bf16.mxu1 %vm3479_vm4, %v3476_v1  ;;  %v4072_v10 = vld [vmem:[#allocation13 + $0x18] sm:$0xff] }
0x126d   :  { %3200 = vmatprep.subr.mxu1 %v3476_v1  ;;  %3167 = vmatpush3.msra.mxu0 %v4072_v10 }
0x126e   :  { %3168 = vmatprep.subr.mxu0 %v3476_v1 }
0x126f   :  { %3185 = vmatmul.mubr.msk.bf16.vlgmr.msra.gmra.mxu1 %vm347_vm6, %v2218_v32  ;;  %3169 = vmatpush3.msra.mxu0 %v4074_v46 }
0x1270   :  { %3201 = vmatpush3.msra.mxu1 %v170_v36  ;;  %3216 = vmatprep.mubr.msk.f32.mxu1 %vm3479_vm4, %v3476_v1 }
0x1271   :  { %3202 = vmatprep.subr.mxu1 %v3476_v1  ;;  %3170 = vmatprep.subr.mxu0 %v3476_v1 }
0x1272   :  { %3203 = vmatpush3.msra.mxu1 %v169_v60  ;;  %3171 = vmatpush3.msra.mxu0 %v4078_v44 }
0x1273   :  { %3204 = vmatprep.subr.mxu1 %v3476_v1  ;;  %3172 = vmatprep.subr.mxu0 %v3476_v1 }
0x1274   :  { %3205 = vmatpush3.msra.mxu1 %v168_v21  ;;  %3173 = vmatpush3.msra.mxu0 %v4082_v22 }
0x1275   :  { %3206 = vmatprep.subr.mxu1 %v3476_v1 }
0x1276   :  { %3207 = vmatpush3.msra.mxu1 %v167_v43 }
0x1277   :  { %3208 = vmatprep.subr.mxu1 %v3476_v1 }
0x1278   :  { %3209 = vmatpush3.msra.mxu1 %v166_v61 }
0x1279   :  { %3210 = vmatprep.subr.mxu1 %v3476_v1 }
0x127a   :  { %3211 = vmatpush3.msra.mxu1 %v165_v30 }
0x127b   :  { %3212 = vmatprep.subr.mxu1 %v3476_v1 }
0x127c   :  { %3213 = vmatpush3.msra.mxu1 %v164_v62 }
0x127d   :  { %3214 = vmatprep.subr.mxu1 %v3476_v1 }
0x127e   :  { %3215 = vmatpush3.msra.mxu1 %v163_v63 }
0x132b   :  { %v2026_v23 = vpop.f32.mrf.mxu1 }
0x132c   :  { %v2036_v26 = vadd.f32 %v4090_v33, %v2026_v23 }
0x132d   :  { %v3165_v27 = vpop.f32.mrf.mxu1 }
0x132e   :  { %v2825_v28 = vmul.f32 -1.442695, %v2036_v26  ;;  %v177_v26 = vld [vmem:[%s4214_s15 + $0x8] sm:$0xff] }
0x132f   :  { %v4093_v34 = vpop.f32.mrf.mxu1 }
0x1330   :  { %3306 = vpow2.f32 %v2825_v28  ;;  %v176_v28 = vld [vmem:[%s4214_s15] sm:$0xff] }
0x1331   :  { %v3186_v18 = vpop.f32.mrf.mxu1 }
0x1333   :  { %v2259_v24 = vpop.f32.mrf.mxu1 }
0x1335   :  { %v3187_v35 = vpop.f32.mrf.mxu1 }
0x133d   :  { %v3307_v57 = vpop.eup %3306 }
0x133e   :  { %v2040_v17 = vadd.f32 1.0, %v3307_v57 }
0x1340   :  { %3308 = vrcp.f32 %v2040_v17 }
0x134d   :  { %v3309_v25 = vpop.eup %3308 }
0x134e   :  { %v2045_v37 = vmul.f32 %v3309_v25, %v1954_v31  ;;  %v2044_v38 = vsub.f32 1.0, %v3309_v25  ;;  %v2043_v41 = vmul.f32 %v3309_v25, %v4050_v16 }
0x1350   :  { %2047 = vrot.lane.b32.xlu1 %v2045_v37, %s3481_s29 }
0x13c2   :  { %v2048_v0 = vpop.permute.xlu1 %2047 }
0x13c3   :  { %3175 = vmatmul.mubr.msk.f32.vlgmr.msra.gmra.mxu0 %vm185_vm0, %v2048_v0 }
0x13c4   :  { %3179 = vmatprep.mubr.msk.f32.mxu0 %vm304_vm1, %v1762_v3 }
0x1483   :  { %v2117_v6 = vpop.f32.mrf.mxu0 }
0x1484   :  { %2122 = vrot.lane.b32.xlu0 %v2117_v6, %s3478_s18  ;;  %v2837_v6 = vld [vmem:[%s4215_s16] ss:$0 sm:$0xff] }
0x1485   :  { %v3176_v7 = vpop.f32.mrf.mxu0 }
0x14f6   :  { %v2123_v4 = vpop.permute.xlu0 %2122 }
0x14f7   :  { %v2125_v45 = vadd.f32 %v2123_v4, %v2026_v23  ;;  %v178_v23 = vld [vmem:[%s4214_s15 + $0x10] sm:$0xff] }
0x14f9   :  { %3310 = vtanh.f32 %v2125_v45 }
0x1506   :  { %v3311_v12 = vpop.eup %3310 }
0x1507   :  { %2128 = vrot.lane.b32.xlu1 %v3311_v12, %s3478_s18 }
0x1579   :  { %v2129_v40 = vpop.permute.xlu1 %2128 }
0x157a   :  { %v2131_v42 = vmul.f32 %v2129_v40, %v2044_v38 }
0x157c   :  { %v2132_v48 = vadd.f32 %v2131_v42, %v2043_v41 }
0x157e   :  { %3177 = vmatprep.subr.mxu0 %v2132_v48 }
0x157f   :  { %3178 = vmatpush3.msra.mxu0 %v2132_v48 }
0x1580   :  { %3180 = vmatmul.mubr.msk.f32.vlgmr.msra.gmra.mxu0 %vm304_vm1, %v1763_v9  ;;  %3188 = vmatprep.subr.mxu0 %v3476_v1 }
0x1581   :  { %3192 = vmatprep.mubr.msk.f32.mxu0 %vm3479_vm4, %v3476_v1 }
0x1640   :  { %v3181_v2 = vpop.f32.mrf.mxu0 }
0x1641   :  { %v2215_v11 = vadd.f32 %v3181_v2, %v4001_v13 }
0x1642   :  { %v2205_v39 = vpop.f32.mrf.mxu0 }
0x1643   :  { %2217 = vst.msk [vmem:[#allocation3 + $0x8] sm:$0xff] %vm185_vm0, %v2215_v11  ;;  %v2214_v8 = vadd.f32 %v2205_v39, %v4005_v56 }
0x1645   :  { %2216 = vst.msk [vmem:[#allocation3] sm:$0xff] %vm185_vm0, %v2214_v8 }
0x164a   :  { %v4115_v51 = vld [vmem:[#allocation3 + $0x8] sm:$0xff] }
0x164b   :  { %3189 = vmatpush3.msra.mxu0 %v4115_v51 }
0x164c   :  { %3190 = vmatprep.subr.mxu0 %v3476_v1  ;;  %v4119_v52 = vld [vmem:[#allocation3] sm:$0xff] }
0x164d   :  { %3191 = vmatpush3.msra.mxu0 %v4119_v52 }
0x164e   :  { %3193 = vmatmul.mubr.msk.f32.vlgmr.msra.gmra.mxu0 %vm347_vm6, %v3704_v49  ;;  %3195 = vmatprep.subr.mxu0 %v3476_v1 }
0x164f   :  { %3197 = vmatprep.mubr.msk.f32.mxu0 %vm3479_vm4, %v3476_v1 }
0x170e   :  { %v2333_v55 = vpop.f32.mrf.mxu0 }
0x170f   :  { %3196 = vmatpush3.msra.mxu0 %v2333_v55 }
0x1710   :  { %v3194_v50 = vpop.f32.mrf.mxu0  ;;  %3198 = vmatmul.mubr.msk.f32.vlgmr.msra.gmra.mxu0 %vm304_vm1, %v3805_v29  ;;  %3219 = vmatprep.subr.mxu0 %v3476_v1 }
0x1711   :  { %3220 = vmatpush3.msra.mxu0 %v4072_v10  ;;  %3227 = vmatprep.mubr.msk.f32.mxu0 %vm3479_vm4, %v3476_v1 }
0x1712   :  { %3221 = vmatprep.subr.mxu0 %v3476_v1 }
0x1713   :  { %3222 = vmatpush3.msra.mxu0 %v4074_v46 }
0x1714   :  { %3223 = vmatprep.subr.mxu0 %v3476_v1 }
0x1715   :  { %3224 = vmatpush3.msra.mxu0 %v4078_v44  ;;  %v182_v44 = vld [vmem:[%s4214_s15 + $0x30] sm:$0xff] }
0x1716   :  { %3225 = vmatprep.subr.mxu0 %v3476_v1 }
0x1717   :  { %3226 = vmatpush3.msra.mxu0 %v4082_v22  ;;  %v181_v22 = vld [vmem:[%s4214_s15 + $0x28] sm:$0xff] }
0x17d0   :  { %v2403_v49 = vpop.f32.mrf.mxu0 }
0x17d1   :  { %2408 = vrot.lane.b32.xlu0 %v2403_v49, %s3480_s7 }
0x17d2   :  { %v3199_v29 = vpop.f32.mrf.mxu0 }
0x1843   :  { %v2409_v5 = vpop.permute.xlu0 %2408 }
0x1844   :  { %v2411_v13 = vsel %vm185_vm0, %v4093_v34, %v2409_v5 }
0x1845   :  { %3217 = vmatmul.mubr.msk.f32.vlgmr.msra.gmra.mxu1 %vm544_vm9, %v2411_v13 }
0x1905   :  { %v2481_v56 = vpop.f32.mrf.mxu1 }
0x1906   :  { %v2485_v58 = vadd.f32 %v4090_v33, %v2481_v56  ;;  %v179_v33 = vld [vmem:[%s4214_s15 + $0x18] sm:$0xff] }
0x1907   :  { %v3218_v59 = vpop.f32.mrf.mxu1 }
0x1908   :  { %v2833_v36 = vmul.f32 -1.442695, %v2485_v58 }
0x190a   :  { %3312 = vpow2.f32 %v2833_v36 }
0x1917   :  { %v3313_v60 = vpop.eup %3312 }
0x1918   :  { %v2489_v1 = vadd.f32 1.0, %v3313_v60 }
0x191a   :  { %3314 = vrcp.f32 %v2489_v1 }
0x1927   :  { %v3315_v21 = vpop.eup %3314 }
0x1928   :  { %v2494_v43 = vmul.f32 %v3315_v21, %v2409_v5  ;;  %v2493_v31 = vsub.f32 1.0, %v3315_v21  ;;  %v2492_v32 = vmul.f32 %v3315_v21, %v2403_v49 }
0x192a   :  { %2496 = vrot.lane.b32.xlu1 %v2494_v43, %s3481_s29 }
0x199c   :  { %v2497_v61 = vpop.permute.xlu1 %2496 }
0x199d   :  { %3228 = vmatmul.mubr.msk.f32.vlgmr.msra.gmra.mxu0 %vm185_vm0, %v2497_v61 }
0x199e   :  { %3232 = vmatprep.mubr.msk.f32.mxu0 %vm304_vm1, %v3655_v15  ;;  %v183_v15 = vld [vmem:[%s4214_s15 + $0x38] sm:$0xff] }
0x199f   :  { %3235 = vmatprep.subr.mxu1 %v183_v15 }
0x19a0   :  { %3236 = vmatpush3.msra.mxu1 %v183_v15 }
0x19a1   :  { %3237 = vmatprep.subr.mxu1 %v182_v44 }
0x19a2   :  { %3238 = vmatpush3.msra.mxu1 %v182_v44 }
0x19a3   :  { %3239 = vmatprep.subr.mxu1 %v181_v22 }
0x19a4   :  { %3240 = vmatpush3.msra.mxu1 %v181_v22 }
0x1a5d   :  { %v2566_v30 = vpop.f32.mrf.mxu0 }
0x1a5e   :  { %2571 = vrot.lane.b32.xlu0 %v2566_v30, %s3478_s18 }
0x1a5f   :  { %v3229_v62 = vpop.f32.mrf.mxu0 }
0x1ad0   :  { %v2572_v63 = vpop.permute.xlu0 %2571 }
0x1ad1   :  { %v2574_v16 = vadd.f32 %v2572_v63, %v2481_v56 }
0x1ad3   :  { %3316 = vtanh.f32 %v2574_v16 }
0x1ae0   :  { %v3317_v19 = vpop.eup %3316 }
0x1ae1   :  { %2577 = vrot.lane.b32.xlu1 %v3317_v19, %s3478_s18 }
0x1b53   :  { %v2578_v20 = vpop.permute.xlu1 %2577 }
0x1b54   :  { %v2580_v10 = vmul.f32 %v2578_v20, %v2493_v31 }
0x1b56   :  { %v2581_v46 = vadd.f32 %v2580_v10, %v2492_v32 }
0x1b58   :  { %3230 = vmatprep.subr.mxu0 %v2581_v46 }
0x1b59   :  { %3231 = vmatpush3.msra.mxu0 %v2581_v46 }
0x1b5a   :  { %3233 = vmatmul.mubr.msk.f32.vlgmr.msra.gmra.mxu0 %vm304_vm1, %v3652_v14  ;;  %v180_v14 = vld [vmem:[%s4214_s15 + $0x20] sm:$0xff] }
0x1b5b   :  { %3241 = vmatprep.subr.mxu1 %v180_v14 }
0x1b5c   :  { %3242 = vmatpush3.msra.mxu1 %v180_v14 }
0x1b5d   :  { %3243 = vmatprep.subr.mxu1 %v179_v33 }
0x1b5e   :  { %3244 = vmatpush3.msra.mxu1 %v179_v33 }
0x1b5f   :  { %3245 = vmatprep.subr.mxu1 %v178_v23 }
0x1b60   :  { %3246 = vmatpush3.msra.mxu1 %v178_v23 }
0x1b61   :  { %3247 = vmatprep.subr.mxu1 %v177_v26 }
0x1b62   :  { %3248 = vmatpush3.msra.mxu1 %v177_v26 }
0x1b63   :  { %3249 = vmatprep.subr.mxu1 %v176_v28 }
0x1b64   :  { %3250 = vmatpush3.msra.mxu1 %v176_v28 }
0x1c1a   :  { %v3234_v27 = vpop.f32.mrf.mxu0 }
0x1c1b   :  { %v2664_v34 = vadd.f32 %v3234_v27, %v4115_v51 }
0x1c1c   :  { %v2654_v18 = vpop.f32.mrf.mxu0 }
0x1c1d   :  { %2666 = vst.msk [vmem:[#allocation3 + $0x8] sm:$0xff] %vm185_vm0, %v2664_v34  ;;  %v2663_v24 = vadd.f32 %v2654_v18, %v4119_v52 }
0x1c1f   :  { %2665 = vst.msk [vmem:[#allocation3] sm:$0xff] %vm185_vm0, %v2663_v24 }
0x1c24   :  { %v2670_v35 = vld [vmem:[#allocation3 + $0x8] sm:$0xff] }
0x1c25   :  { %2675 = vrot.lane.b32.xlu1 %v2670_v35, %s3480_s7 }
0x1c26   :  { %v2669_v57 = vld [vmem:[#allocation3] sm:$0xff] }
0x1c27   :  { %2673 = vrot.lane.b32.xlu0 %v2669_v57, %s3480_s7  ;;  %s3438_s7 = scalar_lea.vmem %s2776_s11, 256 }
0x1c28   :  { %p3439_p2 = scmp.ne.s32.totalorder %s2776_s11, %s3438_s7  ;;  %p3444_p4 = scmp.lt.s32.totalorder %s3438_s7, %s3438_s7 }
0x1c2a   :  { %p3445_p5 = por %p3444_p4, %p3443_p3 }
0x1c2c   :  { %p3446_p6 = pnand %p3445_p5, %p3439_p2 }
0x1c97   :  { %v2676_v17 = vpop.permute.xlu1 %2675 }
0x1c98   :  { %v2680_v0 = vsel %vm185_vm0, %v3993_v53, %v2676_v17 }
0x1c99   :  { %v2674_v25 = vpop.permute.xlu0 %2673 }
0x1c9a   :  { %v2679_v37 = vsel %vm185_vm0, %v3996_v54, %v2674_v25 }
0x1c9b   :  { %3251 = vmatprep.mubr.msk.f32.mxu1 %vm544_vm9, %v2679_v37 }
0x1c9c   :  { %3252 = vmatmul.mubr.msk.f32.vlgmr.msra.gmra.mxu1 %vm544_vm9, %v2680_v0 }
0x1d5c   :  { %v3253_v7 = vpop.f32.mrf.mxu1 }
0x1d5d   :  { %v2765_v4 = vadd.f32 %v3253_v7, %v2837_v6 }
0x1d5e   :  { %v2759_v45 = vpop.f32.mrf.mxu1 }
0x1d5f   :  { %2769 = vst.msk [vmem:[#allocation15 + $0x8] sm:$0xff] %vm185_vm0, %v2765_v4  ;;  %v2760_v47 = vadd.f32 %v2837_v6, %v2759_v45 }
0x1d61   :  { %2768 = vst.msk [vmem:[#allocation15] sm:$0xff] %vm185_vm0, %v2760_v47 }
0x1d62   :  { %3449 = shalt.err (!%p3446_p6)
}
0x1d63   :  { %2781 = dma.vmem_to_hbm [thread:$0]  %s2776_s11, 256, %s4216_s17, [#allocation6], %s3471_s1, %s3471_s1, %s3472_s20  }
0x1d64   :  { %3466 = dma.done.wait [#allocation6], 256  }
0x1d65   :  { %3467 = vsyncadd [#allocation6], 4294967040 }
0x1d66   :  { %2785 = vsyncpa [#allocation5], 1 }
0x1d67   :  { %2786 = vsyncpa [#allocation8], 1 }
0x1d68   :  { %2787 = vsyncpa [#allocation11], 1 }
0x1d69   :  { %2788 = vsyncpa [#allocation14], 1 }
0x1d6a   :  { %2789 = vsyncpa [#allocation6], 1 }

</bundles_post_ra>
